<compile_context>
chip_gen: v6e
topology: v6e:2x2x1
jax: 0.10.0
libtpu: 0.0.40
codegen_flags: <defaults>
</compile_context>

<pallas_src>
import jax
import jax.numpy as jnp
from jax.experimental import pallas as pl
from jax.experimental.pallas import tpu as pltpu

LANE = 128


def gru_encoder_kernel(maxlen_ref, lens_ref, x_ref, wih_ref, whh_ref,
                       bx_ref, bhn_ref, out_ref, gates_ref, h_ref):
    """One time-chunk of the GRU recurrence.

    Scalar prefetch:
      maxlen_ref: (1,) int32 SMEM  -- max(sent_len), used to skip padded chunks.
    Inputs (VMEM blocks):
      lens_ref: (B, 1)  int32  valid lengths (resident across chunks)
      x_ref:    (TC*B, D) f32  this chunk's time-major inputs, flattened (t, b)
      wih_ref:  (D, 3*Hp) f32  gate-stacked input weights (r, z, n), lane padded
      whh_ref:  (Hp, 3*Hp) f32 gate-stacked hidden weights (r, z, n), lane padded
      bx_ref:   (1, 3*Hp) f32  [b_ir+b_hr, b_iz+b_hz, b_in]
      bhn_ref:  (1, Hp)   f32  b_hn (kept separate for the n gate)
    Output:
      out_ref:  (B, Hp)   f32  final hidden state (lane padded, original order)
    Scratch:
      gates_ref: (TC*B, 3*Hp) f32  x-path pre-activations for this chunk
      h_ref:     (B, Hp)      f32  hidden state, persistent across chunks
    """
    c = pl.program_id(0)
    B = lens_ref.shape[0]
    Hp = whh_ref.shape[0]
    TC = x_ref.shape[0] // B
    chunk_start = c * TC

    @pl.when(c == 0)
    def _():
        h_ref[...] = jnp.zeros_like(h_ref)

    # pack_padded_sequence semantics: every row is frozen past its length, so a
    # chunk starting at/after max(sent_len) is a pure no-op -> skip it.
    @pl.when(chunk_start < maxlen_ref[0])
    def _():
        # Phase 1 (off the recurrent chain): ONE MXU matmul for the x-path of
        # all TC timesteps of this chunk, fused x-path biases added once,
        # written to VMEM scratch.
        gates_ref[...] = (
            jnp.dot(x_ref[...], wih_ref[...],
                    preferred_element_type=jnp.float32)
            + bx_ref[...])

        w_hh = whh_ref[...]                                   # (Hp, 3Hp)
        b_hn = jnp.broadcast_to(bhn_ref[...], (B, Hp))        # hoisted once
        lens = lens_ref[...]                                  # (B, 1) int32

        # Phase 2: serial recurrence; only h @ W_hh stays on the chain.
        # TODO(synk): holding W_hh MXU-resident via pltpu.matmul_push_rhs /
        # matmul_acc_lhs / matmul_pop would drop the per-step weight push, but
        # the staging-register / accumulator shape constraints are
        # chip-specific, so the portable jnp.dot is kept here.
        def step(t, h):
            row = pl.multiple_of(t * B, B)
            gx = gates_ref[pl.ds(row, B), :]                  # (B, 3Hp), one vld
            gh = jnp.dot(h, w_hh, preferred_element_type=jnp.float32)
            s_rz = gx[:, :2 * Hp] + gh[:, :2 * Hp]            # one full-width add
            r = jax.nn.sigmoid(s_rz[:, :Hp])
            z = jax.nn.sigmoid(s_rz[:, Hp:])
            n = jnp.tanh(gx[:, 2 * Hp:] + r * (gh[:, 2 * Hp:] + b_hn))
            h_new = (1.0 - z) * n + z * h
            # freeze rows whose valid length is exhausted (h_n semantics)
            return jnp.where(lens > (chunk_start + t), h_new, h)

        h_ref[...] = jax.lax.fori_loop(0, TC, step, h_ref[...],
                                       unroll=(TC <= 8))

    @pl.when(c == pl.num_programs(0) - 1)
    def _():
        out_ref[...] = h_ref[...].astype(out_ref.dtype)


def prepare_gru_params(w_ih, w_hh, b_ih, b_hh):
    """One-time parameter prep (hoisted out of the per-call forward path).

    w_ih: (3, D, H), w_hh: (3, H, H), b_ih/b_hh: (3, 1, H); gate order (r,z,n).
    Pads H up to a multiple of 128 so every gate block starts on a lane
    boundary and gate-stacks the weights so each step needs ONE matmul per
    operand. Padded rows/cols are zero -> valid lanes are unaffected.
    """
    _, _, H = w_ih.shape
    Hp = ((H + LANE - 1) // LANE) * LANE
    pad_c = lambda a: jnp.pad(a, ((0, 0), (0, Hp - H)))            # pad cols
    pad_rc = lambda a: jnp.pad(a, ((0, Hp - H), (0, Hp - H)))      # rows + cols

    w_ih_cat = jnp.concatenate([pad_c(w_ih[g]) for g in range(3)], axis=1)
    w_hh_cat = jnp.concatenate([pad_rc(w_hh[g]) for g in range(3)], axis=1)
    bias_x = jnp.concatenate([pad_c(b_ih[0] + b_hh[0]),
                              pad_c(b_ih[1] + b_hh[1]),
                              pad_c(b_ih[2])], axis=1)             # (1, 3Hp)
    bias_hn = pad_c(b_hh[2])                                       # (1, Hp)
    return {"w_ih": w_ih_cat, "w_hh": w_hh_cat,
            "bias_x": bias_x, "bias_hn": bias_hn, "H": H, "Hp": Hp}


def gru_encoder(sent, sent_len, params, *, t_chunk=None):
    """sent: (T, B, D) f32 time-major, sent_len: (B,) int32.
    params: output of prepare_gru_params. Returns (B, H) final hidden states
    in original batch order."""
    T, B, D = sent.shape
    H, Hp = params["H"], params["Hp"]
    if t_chunk is None:
        t_chunk = T                      # toy sizes: one chunk, one invocation
    assert T % t_chunk == 0, "T must be divisible by t_chunk"
    n_chunks = T // t_chunk

    x2d = sent.reshape(T * B, D)                       # row t*B + b == sent[t, b]
    lens2d = sent_len.astype(jnp.int32).reshape(B, 1)
    max_len = jnp.max(sent_len).astype(jnp.int32).reshape(1)

    grid_spec = pltpu.PrefetchScalarGridSpec(
        num_scalar_prefetch=1,
        grid=(n_chunks,),
        in_specs=[
            pl.BlockSpec((B, 1), lambda c, ml: (0, 0)),              # lens (resident)
            pl.BlockSpec((t_chunk * B, D), lambda c, ml: (c, 0)),    # x chunk (streamed)
            pl.BlockSpec((D, 3 * Hp), lambda c, ml: (0, 0)),         # W_ih (resident)
            pl.BlockSpec((Hp, 3 * Hp), lambda c, ml: (0, 0)),        # W_hh (resident)
            pl.BlockSpec((1, 3 * Hp), lambda c, ml: (0, 0)),         # bias_x
            pl.BlockSpec((1, Hp), lambda c, ml: (0, 0)),             # bias_hn
        ],
        out_specs=pl.BlockSpec((B, Hp), lambda c, ml: (0, 0)),       # resident output
        scratch_shapes=[
            pltpu.VMEM((t_chunk * B, 3 * Hp), jnp.float32),          # gates_x chunk
            pltpu.VMEM((B, Hp), jnp.float32),                        # persistent h
        ],
    )

    out_padded = pl.pallas_call(
        gru_encoder_kernel,
        out_shape=jax.ShapeDtypeStruct((B, Hp), jnp.float32),
        grid_spec=grid_spec,
        compiler_params=pltpu.CompilerParams(
            dimension_semantics=("arbitrary",),      # time chunks are sequential
            vmem_limit_bytes=32 * 1024 * 1024,
        ),
    )(max_len, lens2d, x2d, params["w_ih"], params["w_hh"],
      params["bias_x"], params["bias_hn"])

    return out_padded[:, :H]                         # drop lane padding


def gru_encoder_ref(sent, sent_len, w_ih, w_hh, b_ih, b_hh):
    """Pure-JAX reference of the same semantics (per-gate, unpadded weights)."""
    T, B, _ = sent.shape
    H = w_hh.shape[-1]

    def step(h, inp):
        x_t, t = inp
        r = jax.nn.sigmoid(x_t @ w_ih[0] + b_ih[0] + h @ w_hh[0] + b_hh[0])
        z = jax.nn.sigmoid(x_t @ w_ih[1] + b_ih[1] + h @ w_hh[1] + b_hh[1])
        n = jnp.tanh(x_t @ w_ih[2] + b_ih[2] + r * (h @ w_hh[2] + b_hh[2]))
        h_new = (1.0 - z) * n + z * h
        mask = (sent_len > t)[:, None]
        return jnp.where(mask, h_new, h), None

    h0 = jnp.zeros((B, H), jnp.float32)
    h_final, _ = jax.lax.scan(step, h0, (sent, jnp.arange(T)))
    return h_final


if __name__ == "__main__":
    # config equivalent: word_emb_dim=32, enc_lstm_dim=32, bsize=8, seq len 8
    T, B, D, H = 8, 8, 32, 32

    key = jax.random.PRNGKey(0)
    k_x, k_len, k_wih, k_whh, k_bih, k_bhh = jax.random.split(key, 6)

    sent = jax.random.normal(k_x, (T, B, D), dtype=jnp.float32)
    sent_len = jax.random.randint(k_len, (B,), 1, T + 1, dtype=jnp.int32)

    # Deterministic GRU parameters, uniform(-1/sqrt(H), 1/sqrt(H)) like PyTorch.
    bound = 1.0 / jnp.sqrt(jnp.float32(H))
    w_ih = jax.random.uniform(k_wih, (3, D, H), jnp.float32, -bound, bound)
    w_hh = jax.random.uniform(k_whh, (3, H, H), jnp.float32, -bound, bound)
    b_ih = jax.random.uniform(k_bih, (3, 1, H), jnp.float32, -bound, bound)
    b_hh = jax.random.uniform(k_bhh, (3, 1, H), jnp.float32, -bound, bound)

    # One-time parameter prep (gate stacking + lane padding), hoisted out of
    # the forward call as requested by the review.
    params = prepare_gru_params(w_ih, w_hh, b_ih, b_hh)

    emb = gru_encoder(sent, sent_len, params)
    emb = jax.block_until_ready(emb)

    emb_ref = jax.block_until_ready(
        gru_encoder_ref(sent, sent_len, w_ih, w_hh, b_ih, b_hh))

    assert emb.shape == (B, H)
    assert jnp.allclose(emb, emb_ref, atol=1e-5, rtol=1e-5), "mismatch vs reference"

    print("KERNEL_OK")
</pallas_src>

<mosaic_0001>
module attributes {stable_mosaic.version = 11 : i64} {
  func.func @gru_encoder_kernel(%arg0: i32, %arg1: memref<1xi32, #tpu.memory_space<smem>>, %arg2: memref<8x1xi32, #tpu.memory_space<vmem>>, %arg3: memref<64x32xf32, #tpu.memory_space<vmem>>, %arg4: memref<32x384xf32, #tpu.memory_space<vmem>>, %arg5: memref<128x384xf32, #tpu.memory_space<vmem>>, %arg6: memref<1x384xf32, #tpu.memory_space<vmem>>, %arg7: memref<1x128xf32, #tpu.memory_space<vmem>>, %arg8: memref<8x128xf32, #tpu.memory_space<vmem>>, %arg9: memref<64x384xf32, #tpu.memory_space<vmem>>, %arg10: memref<8x128xf32, #tpu.memory_space<vmem>>) attributes {dimension_semantics = [#tpu.dimension_semantics<arbitrary>], iteration_bounds = array<i64: 1>, scalar_prefetch = 1 : i64, scratch_operands = 2 : i64, tpu.core_type = #tpu.core_type<tc>, window_params = [{pipeline_mode = #tpu.pipeline_mode<synchronous>, transform_indices = @transform_0, window_bounds = array<i64: 8, 1>}, {transform_indices = @transform_1, window_bounds = array<i64: 64, 32>}, {pipeline_mode = #tpu.pipeline_mode<synchronous>, transform_indices = @transform_2, window_bounds = array<i64: 32, 384>}, {pipeline_mode = #tpu.pipeline_mode<synchronous>, transform_indices = @transform_3, window_bounds = array<i64: 128, 384>}, {pipeline_mode = #tpu.pipeline_mode<synchronous>, transform_indices = @transform_4, window_bounds = array<i64: 1, 384>}, {pipeline_mode = #tpu.pipeline_mode<synchronous>, transform_indices = @transform_5, window_bounds = array<i64: 1, 128>}, {pipeline_mode = #tpu.pipeline_mode<synchronous>, transform_indices = @transform_6, window_bounds = array<i64: 8, 128>}]} {
    %c8_i32 = arith.constant 8 : i32
    %0 = arith.muli %arg0, %c8_i32 : i32
    %c0_i32 = arith.constant 0 : i32
    %1 = arith.cmpi eq, %arg0, %c0_i32 : i32
    %2 = arith.extui %1 : i1 to i32
    %c0_i32_0 = arith.constant 0 : i32
    %3 = arith.cmpi ne, %2, %c0_i32_0 : i32
    scf.if %3 {
      %cst = arith.constant 0.000000e+00 : f32
      %11 = vector.broadcast %cst : f32 to vector<8x128xf32>
      %c0_4 = arith.constant 0 : index
      %c0_5 = arith.constant 0 : index
      %12 = vector.load %arg10[%c0_4, %c0_5] : memref<8x128xf32, #tpu.memory_space<vmem>>, vector<8x128xf32>
      tpu.vector_store %arg10[%c0_4, %c0_5], %11 {strides = array<i32>} : memref<8x128xf32, #tpu.memory_space<vmem>>, vector<8x128xf32>,
    } else {
    }
    %c0 = arith.constant 0 : index
    %4 = memref.load %arg1[%c0] : memref<1xi32, #tpu.memory_space<smem>>
    %5 = arith.cmpi slt, %0, %4 : i32
    %6 = arith.extui %5 : i1 to i32
    %c0_i32_1 = arith.constant 0 : i32
    %7 = arith.cmpi ne, %6, %c0_i32_1 : i32
    scf.if %7 {
      %c0_4 = arith.constant 0 : index
      %c0_5 = arith.constant 0 : index
      %11 = vector.load %arg3[%c0_4, %c0_5] : memref<64x32xf32, #tpu.memory_space<vmem>>, vector<64x32xf32>
      %c0_6 = arith.constant 0 : index
      %c0_7 = arith.constant 0 : index
      %12 = vector.load %arg4[%c0_6, %c0_7] : memref<32x384xf32, #tpu.memory_space<vmem>>, vector<32x384xf32>
      %cst = arith.constant dense<0.000000e+00> : vector<64x384xf32>
      %13 = tpu.matmul %11, %12, %cst {dimension_numbers = #tpu.dot_dimension_numbers<[1], [0], [0], [1], [0, 0, 1, 1], [], []>} : vector<64x32xf32>, vector<32x384xf32>, vector<64x384xf32> -> vector<64x384xf32>
      %c0_8 = arith.constant 0 : index
      %c0_9 = arith.constant 0 : index
      %14 = vector.load %arg6[%c0_8, %c0_9] : memref<1x384xf32, #tpu.memory_space<vmem>>, vector<1x384xf32>
      %15 = vector.broadcast %14 : vector<1x384xf32> to vector<64x384xf32>
      %16 = arith.addf %13, %15 : vector<64x384xf32>
      %c0_10 = arith.constant 0 : index
      %c0_11 = arith.constant 0 : index
      %17 = vector.load %arg9[%c0_10, %c0_11] : memref<64x384xf32, #tpu.memory_space<vmem>>, vector<64x384xf32>
      tpu.vector_store %arg9[%c0_10, %c0_11], %16 {strides = array<i32>} : memref<64x384xf32, #tpu.memory_space<vmem>>, vector<64x384xf32>,
      %c0_12 = arith.constant 0 : index
      %c0_13 = arith.constant 0 : index
      %18 = vector.load %arg5[%c0_12, %c0_13] : memref<128x384xf32, #tpu.memory_space<vmem>>, vector<128x384xf32>
      %c0_14 = arith.constant 0 : index
      %c0_15 = arith.constant 0 : index
      %19 = vector.load %arg7[%c0_14, %c0_15] : memref<1x128xf32, #tpu.memory_space<vmem>>, vector<1x128xf32>
      %20 = vector.shape_cast %19 : vector<1x128xf32> to vector<1x128xf32>
      %21 = vector.broadcast %20 : vector<1x128xf32> to vector<8x128xf32>
      %c0_16 = arith.constant 0 : index
      %c0_17 = arith.constant 0 : index
      %22 = vector.load %arg2[%c0_16, %c0_17] : memref<8x1xi32, #tpu.memory_space<vmem>>, vector<8x1xi32>
      %c0_18 = arith.constant 0 : index
      %c0_19 = arith.constant 0 : index
      %23 = vector.load %arg10[%c0_18, %c0_19] : memref<8x128xf32, #tpu.memory_space<vmem>>, vector<8x128xf32>
      %c0_i32_20 = arith.constant 0 : i32
      %c8_i32_21 = arith.constant 8 : i32
      %24 = arith.muli %c0_i32_20, %c8_i32_21 : i32
      %25 = tpu.assume_multiple %24, 8 : i32
      %26 = arith.index_cast %25 : i32 to index
      %c0_22 = arith.constant 0 : index
      %27 = vector.load %arg9[%26, %c0_22] : memref<64x384xf32, #tpu.memory_space<vmem>>, vector<8x384xf32>
      %cst_23 = arith.constant dense<0.000000e+00> : vector<8x384xf32>
      %28 = tpu.matmul %23, %18, %cst_23 {dimension_numbers = #tpu.dot_dimension_numbers<[1], [0], [0], [1], [0, 0, 1, 1], [], []>} : vector<8x128xf32>, vector<128x384xf32>, vector<8x384xf32> -> vector<8x384xf32>
      %29 = vector.extract_strided_slice %27 {offsets = [0, 0], sizes = [8, 256], strides = [1, 1]} : vector<8x384xf32> to vector<8x256xf32>
      %30 = vector.extract_strided_slice %28 {offsets = [0, 0], sizes = [8, 256], strides = [1, 1]} : vector<8x384xf32> to vector<8x256xf32>
      %31 = arith.addf %29, %30 : vector<8x256xf32>
      %32 = vector.extract_strided_slice %31 {offsets = [0, 0], sizes = [8, 128], strides = [1, 1]} : vector<8x256xf32> to vector<8x128xf32>
      %33 = arith.negf %32 : vector<8x128xf32>
      %34 = math.exp %33 : vector<8x128xf32>
      %cst_24 = arith.constant 1.000000e+00 : f32
      %35 = vector.broadcast %cst_24 : f32 to vector<8x128xf32>
      %36 = arith.addf %35, %34 : vector<8x128xf32>
      %37 = arith.divf %35, %36 : vector<8x128xf32>
      %38 = vector.extract_strided_slice %31 {offsets = [0, 128], sizes = [8, 128], strides = [1, 1]} : vector<8x256xf32> to vector<8x128xf32>
      %39 = arith.negf %38 : vector<8x128xf32>
      %40 = math.exp %39 : vector<8x128xf32>
      %cst_25 = arith.constant 1.000000e+00 : f32
      %41 = vector.broadcast %cst_25 : f32 to vector<8x128xf32>
      %42 = arith.addf %41, %40 : vector<8x128xf32>
      %43 = arith.divf %41, %42 : vector<8x128xf32>
      %44 = vector.extract_strided_slice %27 {offsets = [0, 256], sizes = [8, 128], strides = [1, 1]} : vector<8x384xf32> to vector<8x128xf32>
      %45 = vector.extract_strided_slice %28 {offsets = [0, 256], sizes = [8, 128], strides = [1, 1]} : vector<8x384xf32> to vector<8x128xf32>
      %46 = arith.addf %45, %21 : vector<8x128xf32>
      %47 = arith.mulf %37, %46 : vector<8x128xf32>
      %48 = arith.addf %44, %47 : vector<8x128xf32>
      %49 = math.tanh %48 : vector<8x128xf32>
      %cst_26 = arith.constant 1.000000e+00 : f32
      %50 = vector.broadcast %cst_26 : f32 to vector<8x128xf32>
      %51 = arith.subf %50, %43 : vector<8x128xf32>
      %52 = arith.mulf %51, %49 : vector<8x128xf32>
      %53 = arith.mulf %43, %23 : vector<8x128xf32>
      %54 = arith.addf %52, %53 : vector<8x128xf32>
      %55 = arith.addi %0, %c0_i32_20 : i32
      %56 = vector.broadcast %55 : i32 to vector<8x1xi32>
      %57 = arith.cmpi sgt, %22, %56 : vector<8x1xi32>
      %58 = vector.shape_cast %57 : vector<8x1xi1> to vector<8x1xi1>
      %59 = vector.broadcast %58 : vector<8x1xi1> to vector<8x128xi1>
      %60 = arith.select %59, %54, %23 : vector<8x128xi1>, vector<8x128xf32>
      %c1_i32 = arith.constant 1 : i32
      %c8_i32_27 = arith.constant 8 : i32
      %61 = arith.muli %c1_i32, %c8_i32_27 : i32
      %62 = tpu.assume_multiple %61, 8 : i32
      %63 = arith.index_cast %62 : i32 to index
      %c0_28 = arith.constant 0 : index
      %64 = vector.load %arg9[%63, %c0_28] : memref<64x384xf32, #tpu.memory_space<vmem>>, vector<8x384xf32>
      %cst_29 = arith.constant dense<0.000000e+00> : vector<8x384xf32>
      %65 = tpu.matmul %60, %18, %cst_29 {dimension_numbers = #tpu.dot_dimension_numbers<[1], [0], [0], [1], [0, 0, 1, 1], [], []>} : vector<8x128xf32>, vector<128x384xf32>, vector<8x384xf32> -> vector<8x384xf32>
      %66 = vector.extract_strided_slice %64 {offsets = [0, 0], sizes = [8, 256], strides = [1, 1]} : vector<8x384xf32> to vector<8x256xf32>
      %67 = vector.extract_strided_slice %65 {offsets = [0, 0], sizes = [8, 256], strides = [1, 1]} : vector<8x384xf32> to vector<8x256xf32>
      %68 = arith.addf %66, %67 : vector<8x256xf32>
      %69 = vector.extract_strided_slice %68 {offsets = [0, 0], sizes = [8, 128], strides = [1, 1]} : vector<8x256xf32> to vector<8x128xf32>
      %70 = arith.negf %69 : vector<8x128xf32>
      %71 = math.exp %70 : vector<8x128xf32>
      %cst_30 = arith.constant 1.000000e+00 : f32
      %72 = vector.broadcast %cst_30 : f32 to vector<8x128xf32>
      %73 = arith.addf %72, %71 : vector<8x128xf32>
      %74 = arith.divf %72, %73 : vector<8x128xf32>
      %75 = vector.extract_strided_slice %68 {offsets = [0, 128], sizes = [8, 128], strides = [1, 1]} : vector<8x256xf32> to vector<8x128xf32>
      %76 = arith.negf %75 : vector<8x128xf32>
      %77 = math.exp %76 : vector<8x128xf32>
      %cst_31 = arith.constant 1.000000e+00 : f32
      %78 = vector.broadcast %cst_31 : f32 to vector<8x128xf32>
      %79 = arith.addf %78, %77 : vector<8x128xf32>
      %80 = arith.divf %78, %79 : vector<8x128xf32>
      %81 = vector.extract_strided_slice %64 {offsets = [0, 256], sizes = [8, 128], strides = [1, 1]} : vector<8x384xf32> to vector<8x128xf32>
      %82 = vector.extract_strided_slice %65 {offsets = [0, 256], sizes = [8, 128], strides = [1, 1]} : vector<8x384xf32> to vector<8x128xf32>
      %83 = arith.addf %82, %21 : vector<8x128xf32>
      %84 = arith.mulf %74, %83 : vector<8x128xf32>
      %85 = arith.addf %81, %84 : vector<8x128xf32>
      %86 = math.tanh %85 : vector<8x128xf32>
      %cst_32 = arith.constant 1.000000e+00 : f32
      %87 = vector.broadcast %cst_32 : f32 to vector<8x128xf32>
      %88 = arith.subf %87, %80 : vector<8x128xf32>
      %89 = arith.mulf %88, %86 : vector<8x128xf32>
      %90 = arith.mulf %80, %60 : vector<8x128xf32>
      %91 = arith.addf %89, %90 : vector<8x128xf32>
      %92 = arith.addi %0, %c1_i32 : i32
      %93 = vector.broadcast %92 : i32 to vector<8x1xi32>
      %94 = arith.cmpi sgt, %22, %93 : vector<8x1xi32>
      %95 = vector.shape_cast %94 : vector<8x1xi1> to vector<8x1xi1>
      %96 = vector.broadcast %95 : vector<8x1xi1> to vector<8x128xi1>
      %97 = arith.select %96, %91, %60 : vector<8x128xi1>, vector<8x128xf32>
      %c2_i32 = arith.constant 2 : i32
      %c8_i32_33 = arith.constant 8 : i32
      %98 = arith.muli %c2_i32, %c8_i32_33 : i32
      %99 = tpu.assume_multiple %98, 8 : i32
      %100 = arith.index_cast %99 : i32 to index
      %c0_34 = arith.constant 0 : index
      %101 = vector.load %arg9[%100, %c0_34] : memref<64x384xf32, #tpu.memory_space<vmem>>, vector<8x384xf32>
      %cst_35 = arith.constant dense<0.000000e+00> : vector<8x384xf32>
      %102 = tpu.matmul %97, %18, %cst_35 {dimension_numbers = #tpu.dot_dimension_numbers<[1], [0], [0], [1], [0, 0, 1, 1], [], []>} : vector<8x128xf32>, vector<128x384xf32>, vector<8x384xf32> -> vector<8x384xf32>
      %103 = vector.extract_strided_slice %101 {offsets = [0, 0], sizes = [8, 256], strides = [1, 1]} : vector<8x384xf32> to vector<8x256xf32>
      %104 = vector.extract_strided_slice %102 {offsets = [0, 0], sizes = [8, 256], strides = [1, 1]} : vector<8x384xf32> to vector<8x256xf32>
      %105 = arith.addf %103, %104 : vector<8x256xf32>
      %106 = vector.extract_strided_slice %105 {offsets = [0, 0], sizes = [8, 128], strides = [1, 1]} : vector<8x256xf32> to vector<8x128xf32>
      %107 = arith.negf %106 : vector<8x128xf32>
      %108 = math.exp %107 : vector<8x128xf32>
      %cst_36 = arith.constant 1.000000e+00 : f32
      %109 = vector.broadcast %cst_36 : f32 to vector<8x128xf32>
      %110 = arith.addf %109, %108 : vector<8x128xf32>
      %111 = arith.divf %109, %110 : vector<8x128xf32>
      %112 = vector.extract_strided_slice %105 {offsets = [0, 128], sizes = [8, 128], strides = [1, 1]} : vector<8x256xf32> to vector<8x128xf32>
      %113 = arith.negf %112 : vector<8x128xf32>
      %114 = math.exp %113 : vector<8x128xf32>
      %cst_37 = arith.constant 1.000000e+00 : f32
      %115 = vector.broadcast %cst_37 : f32 to vector<8x128xf32>
      %116 = arith.addf %115, %114 : vector<8x128xf32>
      %117 = arith.divf %115, %116 : vector<8x128xf32>
      %118 = vector.extract_strided_slice %101 {offsets = [0, 256], sizes = [8, 128], strides = [1, 1]} : vector<8x384xf32> to vector<8x128xf32>
      %119 = vector.extract_strided_slice %102 {offsets = [0, 256], sizes = [8, 128], strides = [1, 1]} : vector<8x384xf32> to vector<8x128xf32>
      %120 = arith.addf %119, %21 : vector<8x128xf32>
      %121 = arith.mulf %111, %120 : vector<8x128xf32>
      %122 = arith.addf %118, %121 : vector<8x128xf32>
      %123 = math.tanh %122 : vector<8x128xf32>
      %cst_38 = arith.constant 1.000000e+00 : f32
      %124 = vector.broadcast %cst_38 : f32 to vector<8x128xf32>
      %125 = arith.subf %124, %117 : vector<8x128xf32>
      %126 = arith.mulf %125, %123 : vector<8x128xf32>
      %127 = arith.mulf %117, %97 : vector<8x128xf32>
      %128 = arith.addf %126, %127 : vector<8x128xf32>
      %129 = arith.addi %0, %c2_i32 : i32
      %130 = vector.broadcast %129 : i32 to vector<8x1xi32>
      %131 = arith.cmpi sgt, %22, %130 : vector<8x1xi32>
      %132 = vector.shape_cast %131 : vector<8x1xi1> to vector<8x1xi1>
      %133 = vector.broadcast %132 : vector<8x1xi1> to vector<8x128xi1>
      %134 = arith.select %133, %128, %97 : vector<8x128xi1>, vector<8x128xf32>
      %c3_i32 = arith.constant 3 : i32
      %c8_i32_39 = arith.constant 8 : i32
      %135 = arith.muli %c3_i32, %c8_i32_39 : i32
      %136 = tpu.assume_multiple %135, 8 : i32
      %137 = arith.index_cast %136 : i32 to index
      %c0_40 = arith.constant 0 : index
      %138 = vector.load %arg9[%137, %c0_40] : memref<64x384xf32, #tpu.memory_space<vmem>>, vector<8x384xf32>
      %cst_41 = arith.constant dense<0.000000e+00> : vector<8x384xf32>
      %139 = tpu.matmul %134, %18, %cst_41 {dimension_numbers = #tpu.dot_dimension_numbers<[1], [0], [0], [1], [0, 0, 1, 1], [], []>} : vector<8x128xf32>, vector<128x384xf32>, vector<8x384xf32> -> vector<8x384xf32>
      %140 = vector.extract_strided_slice %138 {offsets = [0, 0], sizes = [8, 256], strides = [1, 1]} : vector<8x384xf32> to vector<8x256xf32>
      %141 = vector.extract_strided_slice %139 {offsets = [0, 0], sizes = [8, 256], strides = [1, 1]} : vector<8x384xf32> to vector<8x256xf32>
      %142 = arith.addf %140, %141 : vector<8x256xf32>
      %143 = vector.extract_strided_slice %142 {offsets = [0, 0], sizes = [8, 128], strides = [1, 1]} : vector<8x256xf32> to vector<8x128xf32>
      %144 = arith.negf %143 : vector<8x128xf32>
      %145 = math.exp %144 : vector<8x128xf32>
      %cst_42 = arith.constant 1.000000e+00 : f32
      %146 = vector.broadcast %cst_42 : f32 to vector<8x128xf32>
      %147 = arith.addf %146, %145 : vector<8x128xf32>
      %148 = arith.divf %146, %147 : vector<8x128xf32>
      %149 = vector.extract_strided_slice %142 {offsets = [0, 128], sizes = [8, 128], strides = [1, 1]} : vector<8x256xf32> to vector<8x128xf32>
      %150 = arith.negf %149 : vector<8x128xf32>
      %151 = math.exp %150 : vector<8x128xf32>
      %cst_43 = arith.constant 1.000000e+00 : f32
      %152 = vector.broadcast %cst_43 : f32 to vector<8x128xf32>
      %153 = arith.addf %152, %151 : vector<8x128xf32>
      %154 = arith.divf %152, %153 : vector<8x128xf32>
      %155 = vector.extract_strided_slice %138 {offsets = [0, 256], sizes = [8, 128], strides = [1, 1]} : vector<8x384xf32> to vector<8x128xf32>
      %156 = vector.extract_strided_slice %139 {offsets = [0, 256], sizes = [8, 128], strides = [1, 1]} : vector<8x384xf32> to vector<8x128xf32>
      %157 = arith.addf %156, %21 : vector<8x128xf32>
      %158 = arith.mulf %148, %157 : vector<8x128xf32>
      %159 = arith.addf %155, %158 : vector<8x128xf32>
      %160 = math.tanh %159 : vector<8x128xf32>
      %cst_44 = arith.constant 1.000000e+00 : f32
      %161 = vector.broadcast %cst_44 : f32 to vector<8x128xf32>
      %162 = arith.subf %161, %154 : vector<8x128xf32>
      %163 = arith.mulf %162, %160 : vector<8x128xf32>
      %164 = arith.mulf %154, %134 : vector<8x128xf32>
      %165 = arith.addf %163, %164 : vector<8x128xf32>
      %166 = arith.addi %0, %c3_i32 : i32
      %167 = vector.broadcast %166 : i32 to vector<8x1xi32>
      %168 = arith.cmpi sgt, %22, %167 : vector<8x1xi32>
      %169 = vector.shape_cast %168 : vector<8x1xi1> to vector<8x1xi1>
      %170 = vector.broadcast %169 : vector<8x1xi1> to vector<8x128xi1>
      %171 = arith.select %170, %165, %134 : vector<8x128xi1>, vector<8x128xf32>
      %c4_i32 = arith.constant 4 : i32
      %c8_i32_45 = arith.constant 8 : i32
      %172 = arith.muli %c4_i32, %c8_i32_45 : i32
      %173 = tpu.assume_multiple %172, 8 : i32
      %174 = arith.index_cast %173 : i32 to index
      %c0_46 = arith.constant 0 : index
      %175 = vector.load %arg9[%174, %c0_46] : memref<64x384xf32, #tpu.memory_space<vmem>>, vector<8x384xf32>
      %cst_47 = arith.constant dense<0.000000e+00> : vector<8x384xf32>
      %176 = tpu.matmul %171, %18, %cst_47 {dimension_numbers = #tpu.dot_dimension_numbers<[1], [0], [0], [1], [0, 0, 1, 1], [], []>} : vector<8x128xf32>, vector<128x384xf32>, vector<8x384xf32> -> vector<8x384xf32>
      %177 = vector.extract_strided_slice %175 {offsets = [0, 0], sizes = [8, 256], strides = [1, 1]} : vector<8x384xf32> to vector<8x256xf32>
      %178 = vector.extract_strided_slice %176 {offsets = [0, 0], sizes = [8, 256], strides = [1, 1]} : vector<8x384xf32> to vector<8x256xf32>
      %179 = arith.addf %177, %178 : vector<8x256xf32>
      %180 = vector.extract_strided_slice %179 {offsets = [0, 0], sizes = [8, 128], strides = [1, 1]} : vector<8x256xf32> to vector<8x128xf32>
      %181 = arith.negf %180 : vector<8x128xf32>
      %182 = math.exp %181 : vector<8x128xf32>
      %cst_48 = arith.constant 1.000000e+00 : f32
      %183 = vector.broadcast %cst_48 : f32 to vector<8x128xf32>
      %184 = arith.addf %183, %182 : vector<8x128xf32>
      %185 = arith.divf %183, %184 : vector<8x128xf32>
      %186 = vector.extract_strided_slice %179 {offsets = [0, 128], sizes = [8, 128], strides = [1, 1]} : vector<8x256xf32> to vector<8x128xf32>
      %187 = arith.negf %186 : vector<8x128xf32>
      %188 = math.exp %187 : vector<8x128xf32>
      %cst_49 = arith.constant 1.000000e+00 : f32
      %189 = vector.broadcast %cst_49 : f32 to vector<8x128xf32>
      %190 = arith.addf %189, %188 : vector<8x128xf32>
      %191 = arith.divf %189, %190 : vector<8x128xf32>
      %192 = vector.extract_strided_slice %175 {offsets = [0, 256], sizes = [8, 128], strides = [1, 1]} : vector<8x384xf32> to vector<8x128xf32>
      %193 = vector.extract_strided_slice %176 {offsets = [0, 256], sizes = [8, 128], strides = [1, 1]} : vector<8x384xf32> to vector<8x128xf32>
      %194 = arith.addf %193, %21 : vector<8x128xf32>
      %195 = arith.mulf %185, %194 : vector<8x128xf32>
      %196 = arith.addf %192, %195 : vector<8x128xf32>
      %197 = math.tanh %196 : vector<8x128xf32>
      %cst_50 = arith.constant 1.000000e+00 : f32
      %198 = vector.broadcast %cst_50 : f32 to vector<8x128xf32>
      %199 = arith.subf %198, %191 : vector<8x128xf32>
      %200 = arith.mulf %199, %197 : vector<8x128xf32>
      %201 = arith.mulf %191, %171 : vector<8x128xf32>
      %202 = arith.addf %200, %201 : vector<8x128xf32>
      %203 = arith.addi %0, %c4_i32 : i32
      %204 = vector.broadcast %203 : i32 to vector<8x1xi32>
      %205 = arith.cmpi sgt, %22, %204 : vector<8x1xi32>
      %206 = vector.shape_cast %205 : vector<8x1xi1> to vector<8x1xi1>
      %207 = vector.broadcast %206 : vector<8x1xi1> to vector<8x128xi1>
      %208 = arith.select %207, %202, %171 : vector<8x128xi1>, vector<8x128xf32>
      %c5_i32 = arith.constant 5 : i32
      %c8_i32_51 = arith.constant 8 : i32
      %209 = arith.muli %c5_i32, %c8_i32_51 : i32
      %210 = tpu.assume_multiple %209, 8 : i32
      %211 = arith.index_cast %210 : i32 to index
      %c0_52 = arith.constant 0 : index
      %212 = vector.load %arg9[%211, %c0_52] : memref<64x384xf32, #tpu.memory_space<vmem>>, vector<8x384xf32>
      %cst_53 = arith.constant dense<0.000000e+00> : vector<8x384xf32>
      %213 = tpu.matmul %208, %18, %cst_53 {dimension_numbers = #tpu.dot_dimension_numbers<[1], [0], [0], [1], [0, 0, 1, 1], [], []>} : vector<8x128xf32>, vector<128x384xf32>, vector<8x384xf32> -> vector<8x384xf32>
      %214 = vector.extract_strided_slice %212 {offsets = [0, 0], sizes = [8, 256], strides = [1, 1]} : vector<8x384xf32> to vector<8x256xf32>
      %215 = vector.extract_strided_slice %213 {offsets = [0, 0], sizes = [8, 256], strides = [1, 1]} : vector<8x384xf32> to vector<8x256xf32>
      %216 = arith.addf %214, %215 : vector<8x256xf32>
      %217 = vector.extract_strided_slice %216 {offsets = [0, 0], sizes = [8, 128], strides = [1, 1]} : vector<8x256xf32> to vector<8x128xf32>
      %218 = arith.negf %217 : vector<8x128xf32>
      %219 = math.exp %218 : vector<8x128xf32>
      %cst_54 = arith.constant 1.000000e+00 : f32
      %220 = vector.broadcast %cst_54 : f32 to vector<8x128xf32>
      %221 = arith.addf %220, %219 : vector<8x128xf32>
      %222 = arith.divf %220, %221 : vector<8x128xf32>
      %223 = vector.extract_strided_slice %216 {offsets = [0, 128], sizes = [8, 128], strides = [1, 1]} : vector<8x256xf32> to vector<8x128xf32>
      %224 = arith.negf %223 : vector<8x128xf32>
      %225 = math.exp %224 : vector<8x128xf32>
      %cst_55 = arith.constant 1.000000e+00 : f32
      %226 = vector.broadcast %cst_55 : f32 to vector<8x128xf32>
      %227 = arith.addf %226, %225 : vector<8x128xf32>
      %228 = arith.divf %226, %227 : vector<8x128xf32>
      %229 = vector.extract_strided_slice %212 {offsets = [0, 256], sizes = [8, 128], strides = [1, 1]} : vector<8x384xf32> to vector<8x128xf32>
      %230 = vector.extract_strided_slice %213 {offsets = [0, 256], sizes = [8, 128], strides = [1, 1]} : vector<8x384xf32> to vector<8x128xf32>
      %231 = arith.addf %230, %21 : vector<8x128xf32>
      %232 = arith.mulf %222, %231 : vector<8x128xf32>
      %233 = arith.addf %229, %232 : vector<8x128xf32>
      %234 = math.tanh %233 : vector<8x128xf32>
      %cst_56 = arith.constant 1.000000e+00 : f32
      %235 = vector.broadcast %cst_56 : f32 to vector<8x128xf32>
      %236 = arith.subf %235, %228 : vector<8x128xf32>
      %237 = arith.mulf %236, %234 : vector<8x128xf32>
      %238 = arith.mulf %228, %208 : vector<8x128xf32>
      %239 = arith.addf %237, %238 : vector<8x128xf32>
      %240 = arith.addi %0, %c5_i32 : i32
      %241 = vector.broadcast %240 : i32 to vector<8x1xi32>
      %242 = arith.cmpi sgt, %22, %241 : vector<8x1xi32>
      %243 = vector.shape_cast %242 : vector<8x1xi1> to vector<8x1xi1>
      %244 = vector.broadcast %243 : vector<8x1xi1> to vector<8x128xi1>
      %245 = arith.select %244, %239, %208 : vector<8x128xi1>, vector<8x128xf32>
      %c6_i32 = arith.constant 6 : i32
      %c8_i32_57 = arith.constant 8 : i32
      %246 = arith.muli %c6_i32, %c8_i32_57 : i32
      %247 = tpu.assume_multiple %246, 8 : i32
      %248 = arith.index_cast %247 : i32 to index
      %c0_58 = arith.constant 0 : index
      %249 = vector.load %arg9[%248, %c0_58] : memref<64x384xf32, #tpu.memory_space<vmem>>, vector<8x384xf32>
      %cst_59 = arith.constant dense<0.000000e+00> : vector<8x384xf32>
      %250 = tpu.matmul %245, %18, %cst_59 {dimension_numbers = #tpu.dot_dimension_numbers<[1], [0], [0], [1], [0, 0, 1, 1], [], []>} : vector<8x128xf32>, vector<128x384xf32>, vector<8x384xf32> -> vector<8x384xf32>
      %251 = vector.extract_strided_slice %249 {offsets = [0, 0], sizes = [8, 256], strides = [1, 1]} : vector<8x384xf32> to vector<8x256xf32>
      %252 = vector.extract_strided_slice %250 {offsets = [0, 0], sizes = [8, 256], strides = [1, 1]} : vector<8x384xf32> to vector<8x256xf32>
      %253 = arith.addf %251, %252 : vector<8x256xf32>
      %254 = vector.extract_strided_slice %253 {offsets = [0, 0], sizes = [8, 128], strides = [1, 1]} : vector<8x256xf32> to vector<8x128xf32>
      %255 = arith.negf %254 : vector<8x128xf32>
      %256 = math.exp %255 : vector<8x128xf32>
      %cst_60 = arith.constant 1.000000e+00 : f32
      %257 = vector.broadcast %cst_60 : f32 to vector<8x128xf32>
      %258 = arith.addf %257, %256 : vector<8x128xf32>
      %259 = arith.divf %257, %258 : vector<8x128xf32>
      %260 = vector.extract_strided_slice %253 {offsets = [0, 128], sizes = [8, 128], strides = [1, 1]} : vector<8x256xf32> to vector<8x128xf32>
      %261 = arith.negf %260 : vector<8x128xf32>
      %262 = math.exp %261 : vector<8x128xf32>
      %cst_61 = arith.constant 1.000000e+00 : f32
      %263 = vector.broadcast %cst_61 : f32 to vector<8x128xf32>
      %264 = arith.addf %263, %262 : vector<8x128xf32>
      %265 = arith.divf %263, %264 : vector<8x128xf32>
      %266 = vector.extract_strided_slice %249 {offsets = [0, 256], sizes = [8, 128], strides = [1, 1]} : vector<8x384xf32> to vector<8x128xf32>
      %267 = vector.extract_strided_slice %250 {offsets = [0, 256], sizes = [8, 128], strides = [1, 1]} : vector<8x384xf32> to vector<8x128xf32>
      %268 = arith.addf %267, %21 : vector<8x128xf32>
      %269 = arith.mulf %259, %268 : vector<8x128xf32>
      %270 = arith.addf %266, %269 : vector<8x128xf32>
      %271 = math.tanh %270 : vector<8x128xf32>
      %cst_62 = arith.constant 1.000000e+00 : f32
      %272 = vector.broadcast %cst_62 : f32 to vector<8x128xf32>
      %273 = arith.subf %272, %265 : vector<8x128xf32>
      %274 = arith.mulf %273, %271 : vector<8x128xf32>
      %275 = arith.mulf %265, %245 : vector<8x128xf32>
      %276 = arith.addf %274, %275 : vector<8x128xf32>
      %277 = arith.addi %0, %c6_i32 : i32
      %278 = vector.broadcast %277 : i32 to vector<8x1xi32>
      %279 = arith.cmpi sgt, %22, %278 : vector<8x1xi32>
      %280 = vector.shape_cast %279 : vector<8x1xi1> to vector<8x1xi1>
      %281 = vector.broadcast %280 : vector<8x1xi1> to vector<8x128xi1>
      %282 = arith.select %281, %276, %245 : vector<8x128xi1>, vector<8x128xf32>
      %c7_i32 = arith.constant 7 : i32
      %c8_i32_63 = arith.constant 8 : i32
      %283 = arith.muli %c7_i32, %c8_i32_63 : i32
      %284 = tpu.assume_multiple %283, 8 : i32
      %285 = arith.index_cast %284 : i32 to index
      %c0_64 = arith.constant 0 : index
      %286 = vector.load %arg9[%285, %c0_64] : memref<64x384xf32, #tpu.memory_space<vmem>>, vector<8x384xf32>
      %cst_65 = arith.constant dense<0.000000e+00> : vector<8x384xf32>
      %287 = tpu.matmul %282, %18, %cst_65 {dimension_numbers = #tpu.dot_dimension_numbers<[1], [0], [0], [1], [0, 0, 1, 1], [], []>} : vector<8x128xf32>, vector<128x384xf32>, vector<8x384xf32> -> vector<8x384xf32>
      %288 = vector.extract_strided_slice %286 {offsets = [0, 0], sizes = [8, 256], strides = [1, 1]} : vector<8x384xf32> to vector<8x256xf32>
      %289 = vector.extract_strided_slice %287 {offsets = [0, 0], sizes = [8, 256], strides = [1, 1]} : vector<8x384xf32> to vector<8x256xf32>
      %290 = arith.addf %288, %289 : vector<8x256xf32>
      %291 = vector.extract_strided_slice %290 {offsets = [0, 0], sizes = [8, 128], strides = [1, 1]} : vector<8x256xf32> to vector<8x128xf32>
      %292 = arith.negf %291 : vector<8x128xf32>
      %293 = math.exp %292 : vector<8x128xf32>
      %cst_66 = arith.constant 1.000000e+00 : f32
      %294 = vector.broadcast %cst_66 : f32 to vector<8x128xf32>
      %295 = arith.addf %294, %293 : vector<8x128xf32>
      %296 = arith.divf %294, %295 : vector<8x128xf32>
      %297 = vector.extract_strided_slice %290 {offsets = [0, 128], sizes = [8, 128], strides = [1, 1]} : vector<8x256xf32> to vector<8x128xf32>
      %298 = arith.negf %297 : vector<8x128xf32>
      %299 = math.exp %298 : vector<8x128xf32>
      %cst_67 = arith.constant 1.000000e+00 : f32
      %300 = vector.broadcast %cst_67 : f32 to vector<8x128xf32>
      %301 = arith.addf %300, %299 : vector<8x128xf32>
      %302 = arith.divf %300, %301 : vector<8x128xf32>
      %303 = vector.extract_strided_slice %286 {offsets = [0, 256], sizes = [8, 128], strides = [1, 1]} : vector<8x384xf32> to vector<8x128xf32>
      %304 = vector.extract_strided_slice %287 {offsets = [0, 256], sizes = [8, 128], strides = [1, 1]} : vector<8x384xf32> to vector<8x128xf32>
      %305 = arith.addf %304, %21 : vector<8x128xf32>
      %306 = arith.mulf %296, %305 : vector<8x128xf32>
      %307 = arith.addf %303, %306 : vector<8x128xf32>
      %308 = math.tanh %307 : vector<8x128xf32>
      %cst_68 = arith.constant 1.000000e+00 : f32
      %309 = vector.broadcast %cst_68 : f32 to vector<8x128xf32>
      %310 = arith.subf %309, %302 : vector<8x128xf32>
      %311 = arith.mulf %310, %308 : vector<8x128xf32>
      %312 = arith.mulf %302, %282 : vector<8x128xf32>
      %313 = arith.addf %311, %312 : vector<8x128xf32>
      %314 = arith.addi %0, %c7_i32 : i32
      %315 = vector.broadcast %314 : i32 to vector<8x1xi32>
      %316 = arith.cmpi sgt, %22, %315 : vector<8x1xi32>
      %317 = vector.shape_cast %316 : vector<8x1xi1> to vector<8x1xi1>
      %318 = vector.broadcast %317 : vector<8x1xi1> to vector<8x128xi1>
      %319 = arith.select %318, %313, %282 : vector<8x128xi1>, vector<8x128xf32>
      %c8_i32_69 = arith.constant 8 : i32
      %c0_70 = arith.constant 0 : index
      %c0_71 = arith.constant 0 : index
      %320 = vector.load %arg10[%c0_70, %c0_71] : memref<8x128xf32, #tpu.memory_space<vmem>>, vector<8x128xf32>
      tpu.vector_store %arg10[%c0_70, %c0_71], %319 {strides = array<i32>} : memref<8x128xf32, #tpu.memory_space<vmem>>, vector<8x128xf32>,
    } else {
    }
    %c0_i32_2 = arith.constant 0 : i32
    %8 = arith.cmpi eq, %arg0, %c0_i32_2 : i32
    %9 = arith.extui %8 : i1 to i32
    %c0_i32_3 = arith.constant 0 : i32
    %10 = arith.cmpi ne, %9, %c0_i32_3 : i32
    scf.if %10 {
      %c0_4 = arith.constant 0 : index
      %c0_5 = arith.constant 0 : index
      %11 = vector.load %arg10[%c0_4, %c0_5] : memref<8x128xf32, #tpu.memory_space<vmem>>, vector<8x128xf32>
      %c0_6 = arith.constant 0 : index
      %c0_7 = arith.constant 0 : index
      %12 = vector.load %arg8[%c0_6, %c0_7] : memref<8x128xf32, #tpu.memory_space<vmem>>, vector<8x128xf32>
      tpu.vector_store %arg8[%c0_6, %c0_7], %11 {strides = array<i32>} : memref<8x128xf32, #tpu.memory_space<vmem>>, vector<8x128xf32>,
    } else {
    }
    return
  }
  func.func @transform_0(%arg0: i32, %arg1: memref<1xi32, #tpu.memory_space<smem>>) -> (i32, i32) {
    %c0_i32 = arith.constant 0 : i32
    %c0_i32_0 = arith.constant 0 : i32
    %c0_i32_1 = arith.constant 0 : i32
    return %c0_i32, %c0_i32_0 : i32, i32
  }
  func.func @transform_1(%arg0: i32, %arg1: memref<1xi32, #tpu.memory_space<smem>>) -> (i32, i32) {
    %c0_i32 = arith.constant 0 : i32
    %c0_i32_0 = arith.constant 0 : i32
    return %arg0, %c0_i32 : i32, i32
  }
  func.func @transform_2(%arg0: i32, %arg1: memref<1xi32, #tpu.memory_space<smem>>) -> (i32, i32) {
    %c0_i32 = arith.constant 0 : i32
    %c0_i32_0 = arith.constant 0 : i32
    %c0_i32_1 = arith.constant 0 : i32
    return %c0_i32, %c0_i32_0 : i32, i32
  }
  func.func @transform_3(%arg0: i32, %arg1: memref<1xi32, #tpu.memory_space<smem>>) -> (i32, i32) {
    %c0_i32 = arith.constant 0 : i32
    %c0_i32_0 = arith.constant 0 : i32
    %c0_i32_1 = arith.constant 0 : i32
    return %c0_i32, %c0_i32_0 : i32, i32
  }
  func.func @transform_4(%arg0: i32, %arg1: memref<1xi32, #tpu.memory_space<smem>>) -> (i32, i32) {
    %c0_i32 = arith.constant 0 : i32
    %c0_i32_0 = arith.constant 0 : i32
    %c0_i32_1 = arith.constant 0 : i32
    return %c0_i32, %c0_i32_0 : i32, i32
  }
  func.func @transform_5(%arg0: i32, %arg1: memref<1xi32, #tpu.memory_space<smem>>) -> (i32, i32) {
    %c0_i32 = arith.constant 0 : i32
    %c0_i32_0 = arith.constant 0 : i32
    %c0_i32_1 = arith.constant 0 : i32
    return %c0_i32, %c0_i32_0 : i32, i32
  }
  func.func @transform_6(%arg0: i32, %arg1: memref<1xi32, #tpu.memory_space<smem>>) -> (i32, i32) {
    %c0_i32 = arith.constant 0 : i32
    %c0_i32_0 = arith.constant 0 : i32
    %c0_i32_1 = arith.constant 0 : i32
    return %c0_i32, %c0_i32_0 : i32, i32
  }
}

</mosaic_0001>

<bundles_post_ra>
// kernel: tpu_custom_call.1
= control target key start
LH: loop header
LB: loop body
LE: loop exit
PB: predicated region body
PF: predicated region fallthrough
CT: control target
= control target key end

     0   :  { %13 = vsyncpa [#allocation7], 0  ;;  %s3567_s0 = inlined_call_operand.<no memory space> [shape: s32[1], index: 0, kind: input, shape index: {}]   ;;  %s3568_s1 = inlined_call_operand.vmem [shape: s32[8,1], index: 1, kind: input, shape index: {}]   ;;  %s3569_s2 = inlined_call_operand.vmem [shape: f32[64,32], index: 2, kind: input, shape index: {}]   ;;  %s3570_s3 = inlined_call_operand.vmem [shape: f32[32,384], index: 3, kind: input, shape index: {}]   ;;  %s3571_s4 = inlined_call_operand.hbm [shape: f32[128,384], index: 4, kind: input, shape index: {}]   ;;  %s3572_s5 = inlined_call_operand.vmem [shape: f32[1,384], index: 5, kind: input, shape index: {}]   ;;  %s3573_s6 = inlined_call_operand.vmem [shape: f32[1,128], index: 6, kind: input, shape index: {}]   ;;  %s3574_s7 = inlined_call_operand.hbm [shape: f32[8,128], index: 7, kind: output, shape index: {}]  }
   0x1   :  { %14 = vsyncpa [#allocation8], 0  ;;  %s2529_s24 = smov [#allocation6]  }
   0x2   :  { %s26_s25 = sshll.u32 %s2529_s24, 4  ;;  %s27_s25 = int_to_ptr.vmem [resolvable:$true] %s26_s25 }
   0x3   :  { %s2493_s26 = scalar_lea.vmem %s27_s25, 6144  ;;  %p2498_p1 = scmp.lt.s32.totalorder %s27_s25, %s27_s25 }
   0x4   :  { %p2494_p0 = scmp.ne.s32.totalorder %s27_s25, %s2493_s26  ;;  %p2499_p2 = scmp.lt.s32.totalorder %s2493_s26, %s2493_s26 }
   0x6   :  { %p2500_p3 = por %p2499_p2, %p2498_p1 }
   0x8   :  { %p2501_p4 = pnand %p2500_p3, %p2494_p0 }
   0xa   :  { %2504 = shalt.err (!%p2501_p4)
}
   0xb   :  { %s2530_s27 = smov 384   ;;  %s2531_s28 = smov 24  }
   0xc   :  { %32 = dma.hbm_to_vmem [thread:$0]  %s3571_s4, 6144, %s27_s25, [#allocation7], %s2530_s27, %s2530_s27, %s2531_s28  }
   0xd   :  { %2525 = dma.done.wait [#allocation7], 6144  }
   0xe   :  { %2526 = vsyncadd [#allocation7], 4294961152  ;;  %v2532_v0 = vmov 0.0   ;;  %p1864_p5 = scmp.le.s32.totalorder %s3567_s0, 0 }
   0xf   :  { %45 = vst [vmem:[#allocation3] sm:$0xff] %v2532_v0 }
  0x10   :  { %50 = sbr.rel (%p1864_p5) target bundleno = 2063 (0x80f), region = 37 }
  0x15   :  { %v69_v1 = vld [vmem:[%s3570_s3 + $0x50] sm:$0xff]  ;;  %v68_v2 = vld [vmem:[%s3570_s3 + $0x48] sm:$0xff]  ;;  %v66_v3 = vld [vmem:[%s3570_s3 + $0x38] sm:$0xff]  ;;  %v3579_v5 = vmov 0.0   ;;  %vm88_vm0 = vcmask 261120   ;;  %v3575_v8 = vmov 0  }
  0x16   :  { %137 = vmatprep.subr.mxu0 %v69_v1  ;;  %v65_v4 = vld [vmem:[%s3570_s3 + $0x30] sm:$0xff]  ;;  %177 = vmatprep.mubr.f32.mxu0 %v3579_v5  ;;  %v63_v6 = vld [vmem:[%s3570_s3 + $0x20] sm:$0xff]  ;;  %v62_v9 = vld [vmem:[%s3570_s3 + $0x18] sm:$0xff]  ;;  %vm2535_vm5 = vmmov 0  }
  0x17   :  { %138 = vmatpush1.msra.mxu0 %v68_v2  ;;  %v51_v7 = vld [vmem:[%s3569_s2] sm:$0xff]  ;;  %2354 = vset.pattern.permute.xlu0 %v3575_v8  ;;  %v60_v10 = vld [vmem:[%s3570_s3 + $0x8] sm:$0xff]  ;;  %v2614_v12 = vld [vmem:[#allocation6 + $0x170] sm:$0xff] }
  0x18   :  { %139 = vmatprep.subr.mxu0 %v66_v3  ;;  %2054 = vmatprep.mubr.msk.f32.mxu1 %vm88_vm0, %v51_v7  ;;  %v59_v11 = vld [vmem:[%s3570_s3] sm:$0xff]  ;;  %3604 = vst [vmem:[#allocation12_spill] sm:$0xff] %v2614_v12  ;;  %v2616_v13 = vld [vmem:[#allocation6 + $0x168] sm:$0xff]  ;;  %v2622_v15 = vld [vmem:[#allocation6 + $0x150] sm:$0xff] }
  0x19   :  { %140 = vmatpush1.msra.mxu0 %v65_v4  ;;  %2355 = vset.pattern.permute.xlu1 %v3575_v8  ;;  %v2618_v14 = vld [vmem:[#allocation6 + $0x158] sm:$0xff]  ;;  %v2629_v16 = vld [vmem:[%s3569_s2 + $0x8] sm:$0xff]  ;;  %v2637_v19 = vld [vmem:[#allocation6 + $0x128] sm:$0xff] }
  0x1a   :  { %141 = vmatprep.subr.mxu0 %v63_v6  ;;  %v2631_v17 = vld [vmem:[#allocation6 + $0x140] sm:$0xff]  ;;  %v2634_v18 = vld [vmem:[#allocation6 + $0x138] sm:$0xff]  ;;  %v70_v20 = vld [vmem:[%s3570_s3 + $0x58] sm:$0xff] }
  0x1b   :  { %142 = vmatpush1.msra.mxu0 %v62_v9  ;;  %v2645_v21 = vld [vmem:[#allocation6 + $0x120] sm:$0xff]  ;;  %v2652_v22 = vld [vmem:[%s3569_s2 + $0x10] sm:$0xff]  ;;  %v2654_v23 = vld [vmem:[#allocation6 + $0x110] sm:$0xff]  ;;  %2046 = vmatprep.subr.mxu1 %v70_v20 }
  0x1c   :  { %143 = vmatprep.subr.mxu0 %v60_v10  ;;  %v2657_v24 = vld [vmem:[#allocation6 + $0x108] sm:$0xff]  ;;  %v2660_v25 = vld [vmem:[#allocation6 + $0xf8] sm:$0xff]  ;;  %2047 = vmatpush3.msra.mxu1 %v70_v20  ;;  %v2668_v27 = vld [vmem:[#allocation6 + $0xf0] sm:$0xff] }
  0x1d   :  { %144 = vmatpush1.msra.mxu0 %v59_v11  ;;  %v67_v26 = vld [vmem:[%s3570_s3 + $0x40] sm:$0xff]  ;;  %v2675_v28 = vld [vmem:[%s3569_s2 + $0x18] sm:$0xff]  ;;  %v2677_v29 = vld [vmem:[#allocation6 + $0xe0] sm:$0xff] }
  0x1e   :  { %1865 = vmatmul.mubr.msk.f32.vlgmr.msra.gmra.mxu0 %vm88_vm0, %v51_v7  ;;  %418 = vmatprep.subr.mxu0 %v2614_v12  ;;  %v2680_v30 = vld [vmem:[#allocation6 + $0xd8] sm:$0xff]  ;;  %v2683_v31 = vld [vmem:[#allocation6 + $0xc8] sm:$0xff]  ;;  %v64_v32 = vld [vmem:[%s3570_s3 + $0x28] sm:$0xff] }
  0x1f   :  { %419 = vmatpush1.msra.mxu0 %v2616_v13  ;;  %183 = vmatprep.mubr.f32.mxu0 %v3579_v5  ;;  %v2691_v33 = vld [vmem:[#allocation6 + $0xc0] sm:$0xff]  ;;  %v2698_v34 = vld [vmem:[%s3569_s2 + $0x20] sm:$0xff]  ;;  %v2700_v35 = vld [vmem:[#allocation6 + $0xb0] sm:$0xff] }
  0x20   :  { %420 = vmatprep.subr.mxu0 %v2618_v14  ;;  %2048 = vmatprep.subr.mxu1 %v67_v26  ;;  %v2703_v36 = vld [vmem:[#allocation6 + $0xa8] sm:$0xff]  ;;  %v2706_v37 = vld [vmem:[#allocation6 + $0x98] sm:$0xff]  ;;  %v2714_v39 = vld [vmem:[#allocation6 + $0x90] sm:$0xff] }
  0x21   :  { %421 = vmatpush1.msra.mxu0 %v2622_v15  ;;  %2049 = vmatpush3.msra.mxu1 %v67_v26  ;;  %v61_v38 = vld [vmem:[%s3570_s3 + $0x10] sm:$0xff]  ;;  %v2721_v40 = vld [vmem:[%s3569_s2 + $0x28] sm:$0xff]  ;;  %v2726_v42 = vld [vmem:[#allocation6 + $0x78] sm:$0xff]  ;;  %v73_v26 = vlaneseq }
  0x22   :  { %1866 = vmatmul.mubr.msk.f32.gmra.mxu0 %vm88_vm0, %v2629_v16  ;;  %422 = vmatprep.subr.mxu0 %v2631_v17  ;;  %v2723_v41 = vld [vmem:[#allocation6 + $0x80] sm:$0xff]  ;;  %v2729_v43 = vld [vmem:[#allocation6 + $0x68] sm:$0xff]  ;;  %v2743_v46 = vld [vmem:[#allocation6 + $0x50] sm:$0xff] }
  0x23   :  { %423 = vmatpush1.msra.mxu0 %v2634_v18  ;;  %189 = vmatprep.mubr.f32.mxu0 %v3579_v5  ;;  %v2734_v44 = vld [vmem:[#allocation6 + $0x60] sm:$0xff]  ;;  %v2741_v45 = vld [vmem:[%s3569_s2 + $0x30] sm:$0xff]  ;;  %v2750_v48 = vld [vmem:[#allocation6 + $0x38] sm:$0xff] }
  0x24   :  { %424 = vmatprep.subr.mxu0 %v2637_v19  ;;  %2050 = vmatprep.subr.mxu1 %v64_v32  ;;  %v2746_v47 = vld [vmem:[#allocation6 + $0x48] sm:$0xff]  ;;  %v2754_v49 = vld [vmem:[#allocation6 + $0x178] sm:$0xff]  ;;  %v2759_v50 = vld [vmem:[#allocation6 + $0x30] sm:$0xff] }
  0x25   :  { %425 = vmatpush1.msra.mxu0 %v2645_v21  ;;  %2051 = vmatpush3.msra.mxu1 %v64_v32  ;;  %v58_v51 = vld [vmem:[%s3569_s2 + $0x38] sm:$0xff]  ;;  %v2766_v52 = vld [vmem:[#allocation6 + $0x20] sm:$0xff]  ;;  %v2771_v53 = vld [vmem:[%s3568_s1] sm:$0xff] }
  0x26   :  { %1867 = vmatmul.mubr.msk.f32.gmra.mxu0 %vm88_vm0, %v2652_v22  ;;  %426 = vmatprep.subr.mxu0 %v2654_v23  ;;  %3605 = vst [vmem:[#allocation13_spill] sm:$0xff] %v2766_v52  ;;  %3606 = vst [vmem:[#allocation14_spill] sm:$0xff] %v2771_v53  ;;  %v2774_v54 = vld [vmem:[#allocation6 + $0x18] sm:$0xff]  ;;  %v2778_v55 = vld [vmem:[#allocation6 + $0x8] sm:$0xff]  ;;  %vm582_vm1 = vcmp.gt.s32.totalorder %v2771_v53, 0  ;;  %vm760_vm2 = vcmp.gt.s32.totalorder %v2771_v53, 1 }
  0x27   :  { %427 = vmatpush1.msra.mxu0 %v2657_v24  ;;  %195 = vmatprep.mubr.f32.mxu0 %v3579_v5  ;;  %3607 = vst [vmem:[#allocation15_spill] sm:$0xff] %v2774_v54  ;;  %3608 = vst [vmem:[#allocation16_spill] sm:$0xff] %v2778_v55  ;;  %v2781_v56 = vld [vmem:[#allocation6 + $0x160] sm:$0xff]  ;;  %v2790_v58 = vld [vmem:[#allocation3] sm:$0xff]  ;;  %v583_v61 = vsel %vm582_vm1, 1, %v3575_v8  ;;  %v761_v0 = vsel %vm760_vm2, 1, %v3575_v8 }
  0x28   :  { %428 = vmatprep.subr.mxu0 %v2660_v25  ;;  %2052 = vmatprep.subr.mxu1 %v61_v38  ;;  %v2785_v57 = vld [vmem:[#allocation6] sm:$0xff]  ;;  %v2792_v59 = vld [vmem:[#allocation6 + $0x148] sm:$0xff]  ;;  %v2798_v60 = vld [vmem:[#allocation6 + $0x130] sm:$0xff]  ;;  %vm1294_vm3 = vcmp.gt.s32.totalorder %v2771_v53, 4  ;;  %vm1650_vm4 = vcmp.gt.s32.totalorder %v2771_v53, 6 }
  0x29   :  { %429 = vmatpush1.msra.mxu0 %v2668_v27  ;;  %2053 = vmatpush3.msra.mxu1 %v61_v38  ;;  %3609 = vst [vmem:[#allocation17_spill] sm:$0xff] %v2785_v57  ;;  %v2805_v62 = vld [vmem:[#allocation6 + $0x118] sm:$0xff]  ;;  %v2811_v63 = vld [vmem:[#allocation6 + $0x100] sm:$0xff]  ;;  %v2821_v1 = vld [vmem:[#allocation6 + $0xe8] sm:$0xff]  ;;  %v1295_v3 = vsel %vm1294_vm3, 1, %v3575_v8  ;;  %v1651_v7 = vsel %vm1650_vm4, 1, %v3575_v8 }
  0x2a   :  { %1868 = vmatmul.mubr.msk.f32.gmra.mxu0 %vm88_vm0, %v2675_v28  ;;  %430 = vmatprep.subr.mxu0 %v2677_v29  ;;  %v2826_v2 = vld [vmem:[#allocation6 + $0xd0] sm:$0xff]  ;;  %v2836_v4 = vld [vmem:[#allocation6 + $0xb8] sm:$0xff]  ;;  %v2841_v6 = vld [vmem:[#allocation6 + $0xa0] sm:$0xff] }
  0x2b   :  { %431 = vmatpush1.msra.mxu0 %v2680_v30  ;;  %201 = vmatprep.mubr.f32.mxu0 %v3579_v5  ;;  %v2849_v9 = vld [vmem:[#allocation6 + $0x88] sm:$0xff]  ;;  %v2854_v10 = vld [vmem:[#allocation6 + $0x70] sm:$0xff]  ;;  %v2860_v11 = vld [vmem:[#allocation6 + $0x58] sm:$0xff] }
  0x2c   :  { %432 = vmatprep.subr.mxu0 %v2683_v31  ;;  %2066 = vmatprep.subr.mxu1 %v3579_v5  ;;  %v2872_v20 = vld [vmem:[#allocation6 + $0x28] sm:$0xff] }
  0x2d   :  { %433 = vmatpush1.msra.mxu0 %v2691_v33  ;;  %2055 = vmatmul.mubr.msk.f32.vlgmr.msra.gmra.mxu1 %vm88_vm0, %v2629_v16  ;;  %v2866_v16 = vld [vmem:[#allocation6 + $0x40] sm:$0xff]  ;;  %3610 = vst [vmem:[#allocation18_spill] sm:$0xff] %v2872_v20 }
  0x2e   :  { %1869 = vmatmul.mubr.msk.f32.gmra.mxu0 %vm88_vm0, %v2698_v34  ;;  %434 = vmatprep.subr.mxu0 %v2700_v35 }
  0x2f   :  { %435 = vmatpush1.msra.mxu0 %v2703_v36  ;;  %207 = vmatprep.mubr.f32.mxu0 %v3579_v5 }
  0x30   :  { %436 = vmatprep.subr.mxu0 %v2706_v37  ;;  %2067 = vmatpush3.msra.mxu1 %v2754_v49 }
  0x31   :  { %437 = vmatpush1.msra.mxu0 %v2714_v39  ;;  %2068 = vmatprep.subr.mxu1 %v3579_v5 }
  0x32   :  { %1870 = vmatmul.mubr.msk.f32.gmra.mxu0 %vm88_vm0, %v2721_v40  ;;  %438 = vmatprep.subr.mxu0 %v2723_v41 }
  0x33   :  { %439 = vmatpush1.msra.mxu0 %v2726_v42  ;;  %213 = vmatprep.mubr.f32.mxu0 %v3579_v5 }
  0x34   :  { %440 = vmatprep.subr.mxu0 %v2729_v43  ;;  %2069 = vmatpush3.msra.mxu1 %v2781_v56 }
  0x35   :  { %441 = vmatpush1.msra.mxu0 %v2734_v44  ;;  %2070 = vmatprep.subr.mxu1 %v3579_v5 }
  0x36   :  { %1871 = vmatmul.mubr.msk.f32.gmra.mxu0 %vm88_vm0, %v2741_v45  ;;  %442 = vmatprep.subr.mxu0 %v2743_v46 }
  0x37   :  { %443 = vmatpush1.msra.mxu0 %v2746_v47  ;;  %219 = vmatprep.mubr.f32.mxu0 %v3579_v5 }
  0x38   :  { %444 = vmatprep.subr.mxu0 %v2750_v48  ;;  %2071 = vmatpush3.msra.mxu1 %v2792_v59 }
  0x39   :  { %445 = vmatpush1.msra.mxu0 %v2759_v50  ;;  %2072 = vmatprep.subr.mxu1 %v3579_v5 }
  0x3a   :  { %1872 = vmatmul.mubr.msk.f32.gmra.mxu0 %vm88_vm0, %v58_v51  ;;  %446 = vmatprep.subr.mxu0 %v2766_v52 }
  0x3b   :  { %447 = vmatpush1.msra.mxu0 %v2774_v54  ;;  %482 = vmatprep.mubr.f32.mxu0 %v3579_v5 }
  0x3c   :  { %448 = vmatprep.subr.mxu0 %v2778_v55  ;;  %2057 = vmatprep.mubr.msk.f32.mxu1 %vm88_vm0, %v2652_v22  ;;  %v2878_v22 = vld [vmem:[#allocation6 + $0x10] sm:$0xff] }
  0x3d   :  { %449 = vmatpush1.msra.mxu0 %v2785_v57  ;;  %2073 = vmatpush3.msra.mxu1 %v2798_v60  ;;  %3611 = vst [vmem:[#allocation19_spill] sm:$0xff] %v2878_v22 }
  0x3e   :  { %483 = vmatmul.mubr.f32.vlgmr.msra.gmra.mxu0 %v2790_v58  ;;  %585 = vperm.xlu0 %2354, %v583_v61  }
  0x3f   :  { %2074 = vmatprep.subr.mxu1 %v3579_v5  ;;  %2058 = vmatmul.mubr.msk.f32.gmra.mxu1 %vm88_vm0, %v2675_v28  ;;  %v74_v28 = vshrl.u32 %v73_v26, 7 }
  0x40   :  { %2075 = vmatpush3.msra.mxu1 %v2805_v62  ;;  %2060 = vmatprep.mubr.msk.f32.mxu1 %vm88_vm0, %v2698_v34  ;;  %v71_v34 = vld [vmem:[%s3572_s5] sm:$0x7] }
  0x41   :  { %2076 = vmatprep.subr.mxu1 %v3579_v5  ;;  %595 = vmatprep.subr.mxu0 %v2614_v12  ;;  %v75_v32 = vsub.s32 0, %v74_v28 }
  0x42   :  { %2077 = vmatpush3.msra.mxu1 %v2811_v63  ;;  %763 = vperm.xlu0 %2354, %v761_v0  }
  0x43   :  { %2078 = vmatprep.subr.mxu1 %v3579_v5  ;;  %2061 = vmatmul.mubr.msk.f32.gmra.mxu1 %vm88_vm0, %v2721_v40  ;;  %v79_v40 = vsub.s32 1, %v74_v28 }
  0x44   :  { %2079 = vmatpush3.msra.mxu1 %v2821_v1  ;;  %2063 = vmatprep.mubr.msk.f32.mxu1 %vm88_vm0, %v2741_v45 }
  0x45   :  { %2080 = vmatprep.subr.mxu1 %v3579_v5  ;;  %596 = vmatpush1.msra.mxu0 %v2616_v13  ;;  %v80_v0 = vrot.slane %v71_v34, %v79_v40 }
  0x46   :  { %2081 = vmatpush3.msra.mxu1 %v2826_v2  ;;  %1297 = vperm.xlu0 %2354, %v1295_v3  }
  0x47   :  { %2082 = vmatprep.subr.mxu1 %v3579_v5  ;;  %2064 = vmatmul.mubr.msk.f32.gmra.mxu1 %vm88_vm0, %v58_v51  ;;  %v76_v51 = vrot.slane %v71_v34, %v75_v32 }
  0x48   :  { %2083 = vmatpush3.msra.mxu1 %v2836_v4  ;;  %2098 = vmatprep.mubr.msk.f32.mxu1 %vm2535_vm5, %v3579_v5 }
  0x49   :  { %2084 = vmatprep.subr.mxu1 %v3579_v5  ;;  %597 = vmatprep.subr.mxu0 %v2618_v14 }
  0x4a   :  { %2085 = vmatpush3.msra.mxu1 %v2841_v6  ;;  %1653 = vperm.xlu0 %2354, %v1651_v7  }
  0x4b   :  { %2086 = vmatprep.subr.mxu1 %v3579_v5  ;;  %598 = vmatpush1.msra.mxu0 %v2622_v15 }
  0x4c   :  { %2087 = vmatpush3.msra.mxu1 %v2849_v9  ;;  %599 = vmatprep.subr.mxu0 %v2631_v17 }
  0x4d   :  { %2088 = vmatprep.subr.mxu1 %v3579_v5  ;;  %600 = vmatpush1.msra.mxu0 %v2634_v18 }
  0x4e   :  { %2089 = vmatpush3.msra.mxu1 %v2854_v10  ;;  %601 = vmatprep.subr.mxu0 %v2637_v19 }
  0x4f   :  { %2090 = vmatprep.subr.mxu1 %v3579_v5  ;;  %602 = vmatpush1.msra.mxu0 %v2645_v21 }
  0x50   :  { %2091 = vmatpush3.msra.mxu1 %v2860_v11  ;;  %603 = vmatprep.subr.mxu0 %v2654_v23 }
  0x51   :  { %2092 = vmatprep.subr.mxu1 %v3579_v5  ;;  %604 = vmatpush1.msra.mxu0 %v2657_v24 }
  0x52   :  { %2093 = vmatpush3.msra.mxu1 %v2866_v16  ;;  %605 = vmatprep.subr.mxu0 %v2660_v25 }
  0x53   :  { %2094 = vmatprep.subr.mxu1 %v3579_v5  ;;  %606 = vmatpush1.msra.mxu0 %v2668_v27 }
  0x54   :  { %2095 = vmatpush3.msra.mxu1 %v2872_v20  ;;  %607 = vmatprep.subr.mxu0 %v2677_v29 }
  0x55   :  { %2096 = vmatprep.subr.mxu1 %v3579_v5  ;;  %608 = vmatpush1.msra.mxu0 %v2680_v30 }
  0x56   :  { %2097 = vmatpush3.msra.mxu1 %v2878_v22  ;;  %609 = vmatprep.subr.mxu0 %v2683_v31 }
  0x57   :  { %2099 = vmatmul.mubr.f32.vlgmr.msra.gmra.mxu1 %v2790_v58  ;;  %2101 = vmatprep.subr.mxu1 %v3579_v5 }
  0x58   :  { %2102 = vmatpush3.msra.mxu1 %v2754_v49  ;;  %610 = vmatpush1.msra.mxu0 %v2691_v33 }
  0x59   :  { %2103 = vmatprep.subr.mxu1 %v3579_v5  ;;  %611 = vmatprep.subr.mxu0 %v2700_v35 }
  0x5a   :  { %2104 = vmatpush3.msra.mxu1 %v2781_v56  ;;  %612 = vmatpush1.msra.mxu0 %v2703_v36 }
  0x5b   :  { %2105 = vmatprep.subr.mxu1 %v3579_v5  ;;  %613 = vmatprep.subr.mxu0 %v2706_v37 }
  0x5c   :  { %2106 = vmatpush3.msra.mxu1 %v2792_v59  ;;  %614 = vmatpush1.msra.mxu0 %v2714_v39 }
  0x5d   :  { %2107 = vmatprep.subr.mxu1 %v3579_v5  ;;  %615 = vmatprep.subr.mxu0 %v2723_v41 }
  0x5e   :  { %2108 = vmatpush3.msra.mxu1 %v2798_v60  ;;  %616 = vmatpush1.msra.mxu0 %v2726_v42 }
  0x5f   :  { %2109 = vmatprep.subr.mxu1 %v3579_v5  ;;  %617 = vmatprep.subr.mxu0 %v2729_v43 }
  0x60   :  { %2110 = vmatpush3.msra.mxu1 %v2805_v62  ;;  %618 = vmatpush1.msra.mxu0 %v2734_v44 }
  0x61   :  { %2111 = vmatprep.subr.mxu1 %v3579_v5  ;;  %619 = vmatprep.subr.mxu0 %v2743_v46 }
  0x62   :  { %2112 = vmatpush3.msra.mxu1 %v2811_v63  ;;  %620 = vmatpush1.msra.mxu0 %v2746_v47 }
  0x63   :  { %2113 = vmatprep.subr.mxu1 %v3579_v5  ;;  %621 = vmatprep.subr.mxu0 %v2750_v48 }
  0x64   :  { %2114 = vmatpush3.msra.mxu1 %v2821_v1  ;;  %622 = vmatpush1.msra.mxu0 %v2759_v50 }
  0x65   :  { %2115 = vmatprep.subr.mxu1 %v3579_v5  ;;  %623 = vmatprep.subr.mxu0 %v2766_v52 }
  0x66   :  { %2116 = vmatpush3.msra.mxu1 %v2826_v2  ;;  %624 = vmatpush1.msra.mxu0 %v2774_v54  ;;  %v83_v54 = vsub.s32 2, %v74_v28 }
  0x67   :  { %2117 = vmatprep.subr.mxu1 %v3579_v5  ;;  %625 = vmatprep.subr.mxu0 %v2778_v55 }
  0x68   :  { %2118 = vmatpush3.msra.mxu1 %v2836_v4  ;;  %626 = vmatpush1.msra.mxu0 %v2785_v57 }
  0x69   :  { %2119 = vmatprep.subr.mxu1 %v3579_v5  ;;  %659 = vmatprep.mubr.f32.mxu0 %v3579_v5 }
  0x6a   :  { %2120 = vmatpush3.msra.mxu1 %v2841_v6  ;;  %2133 = vmatprep.mubr.msk.f32.mxu1 %vm2535_vm5, %v3579_v5 }
  0x6b   :  { %2121 = vmatprep.subr.mxu1 %v3579_v5  ;;  %773 = vmatprep.subr.mxu0 %v2614_v12 }
  0x6c   :  { %2122 = vmatpush3.msra.mxu1 %v2849_v9 }
  0x6d   :  { %2123 = vmatprep.subr.mxu1 %v3579_v5 }
  0x6e   :  { %2124 = vmatpush3.msra.mxu1 %v2854_v10 }
  0x6f   :  { %2125 = vmatprep.subr.mxu1 %v3579_v5 }
  0x70   :  { %2126 = vmatpush3.msra.mxu1 %v2860_v11 }
  0x71   :  { %2127 = vmatprep.subr.mxu1 %v3579_v5 }
  0x72   :  { %2128 = vmatpush3.msra.mxu1 %v2866_v16 }
  0x73   :  { %2129 = vmatprep.subr.mxu1 %v3579_v5 }
  0x74   :  { %2130 = vmatpush3.msra.mxu1 %v2872_v20 }
  0x75   :  { %2131 = vmatprep.subr.mxu1 %v3579_v5 }
  0x76   :  { %2132 = vmatpush3.msra.mxu1 %v2878_v22 }
  0x77   :  { %2136 = vmatprep.subr.mxu1 %v3579_v5 }
  0xde   :  { %v179_v38 = vpop.f32.mrf.mxu0 }
  0xe0   :  { %v181_v45 = vpop.f32.mrf.mxu0 }
  0xe2   :  { %v185_v61 = vpop.f32.mrf.mxu0 }
  0xe3   :  { %v2945_v3 = vadd.f32 %v185_v61, %v76_v51 }
  0xe4   :  { %v187_v7 = vpop.f32.mrf.mxu0 }
  0xe5   :  { %3612 = vst [vmem:[#allocation20_spill] sm:$0xff] %v2945_v3  ;;  %v2947_v8 = vadd.f32 %v187_v7, %v80_v0 }
  0xe6   :  { %v191_v53 = vpop.f32.mrf.mxu0 }
  0xe7   :  { %3613 = vst [vmem:[#allocation21_spill] sm:$0xff] %v2947_v8  ;;  %v2949_v5 = vadd.f32 %v191_v53, %v76_v51  ;;  %v84_v8 = vrot.slane %v71_v34, %v83_v54 }
  0xe8   :  { %v193_v26 = vpop.f32.mrf.mxu0 }
  0xe9   :  { %3614 = vst [vmem:[#allocation22_spill] sm:$0xff] %v2949_v5  ;;  %v2951_v12 = vadd.f32 %v193_v26, %v80_v0 }
  0xea   :  { %v197_v22 = vpop.f32.mrf.mxu0 }
  0xeb   :  { %3615 = vst [vmem:[#allocation23_spill] sm:$0xff] %v2951_v12  ;;  %v2953_v57 = vadd.f32 %v197_v22, %v76_v51 }
  0xec   :  { %v199_v55 = vpop.f32.mrf.mxu0 }
  0xed   :  { %3616 = vst [vmem:[#allocation24_spill] sm:$0xff] %v2953_v57  ;;  %v2955_v20 = vadd.f32 %v199_v55, %v80_v0  ;;  %v2056_v12 = vpop.f32.mrf.mxu1 }
  0xee   :  { %v203_v32 = vpop.f32.mrf.mxu0  ;;  %v2965_v57 = vadd.f32 %v2056_v12, %v84_v8 }
  0xef   :  { %3617 = vst [vmem:[#allocation25_spill] sm:$0xff] %v2955_v20  ;;  %v2957_v40 = vadd.f32 %v203_v32, %v76_v51 }
  0xf0   :  { %v205_v61 = vpop.f32.mrf.mxu0 }
  0xf1   :  { %3618 = vst [vmem:[#allocation26_spill] sm:$0xff] %v2957_v40  ;;  %v2959_v3 = vadd.f32 %v205_v61, %v80_v0 }
  0xf2   :  { %v209_v7 = vpop.f32.mrf.mxu0 }
  0xf3   :  { %3619 = vst [vmem:[#allocation27_spill] sm:$0xff] %v2959_v3  ;;  %v2961_v53 = vadd.f32 %v209_v7, %v76_v51  ;;  %v180_v3 = vadd.f32 %v179_v38, %v76_v51 }
  0xf4   :  { %v211_v5 = vpop.f32.mrf.mxu0 }
  0xf5   :  { %3620 = vst [vmem:[#allocation28_spill] sm:$0xff] %v2961_v53  ;;  %v2963_v26 = vadd.f32 %v211_v5, %v80_v0  ;;  %v292_v5 = vpop.f32.mrf.mxu1 }
  0xf6   :  { %v215_v22 = vpop.f32.mrf.mxu0 }
  0xf7   :  { %3621 = vst [vmem:[#allocation29_spill] sm:$0xff] %v2963_v26  ;;  %v2967_v55 = vadd.f32 %v215_v22, %v76_v51  ;;  %v182_v22 = vadd.f32 %v181_v45, %v80_v0 }
  0xf8   :  { %v217_v20 = vpop.f32.mrf.mxu0 }
  0xf9   :  { %3622 = vst [vmem:[#allocation30_spill] sm:$0xff] %v2967_v55  ;;  %v2969_v28 = vadd.f32 %v217_v20, %v80_v0 }
  0xfa   :  { %v221_v32 = vpop.f32.mrf.mxu0 }
  0xfb   :  { %3623 = vst [vmem:[#allocation31_spill] sm:$0xff] %v2969_v28  ;;  %v2971_v40 = vadd.f32 %v221_v32, %v76_v51 }
  0xfc   :  { %v223_v61 = vpop.f32.mrf.mxu0 }
  0xfd   :  { %3624 = vst [vmem:[#allocation32_spill] sm:$0xff] %v2971_v40  ;;  %v2973_v54 = vadd.f32 %v223_v61, %v80_v0 }
  0xfe   :  { %v484_v34 = vpop.f32.mrf.mxu0 }
  0xff   :  { %3625 = vst [vmem:[#allocation33_spill] sm:$0xff] %v2973_v54  ;;  %v559_v7 = vadd.f32 %v484_v34, %v180_v3  ;;  %v2059_v53 = vpop.f32.mrf.mxu1 }
 0x100   :  { %v486_v52 = vpop.f32.mrf.mxu0  ;;  %v2975_v12 = vadd.f32 %v2059_v53, %v84_v8 }
 0x101   :  { %v1882_v26 = vmul.f32 -1.442695, %v559_v7  ;;  %v302_v55 = vpop.f32.mrf.mxu1  ;;  %v560_v28 = vadd.f32 %v486_v52, %v182_v22  ;;  %v2990_v52 = vld [vmem:[%s3573_s6] ss:$0 sm:$0xff] }
 0x102   :  { %3626 = vst [vmem:[#allocation34_spill] sm:$0xff] %v2975_v12  ;;  %v2977_v20 = vadd.f32 %v302_v55, %v84_v8 }
 0x103   :  { %2356 = vpow2.f32 %v1882_v26  ;;  %v2062_v32 = vpop.f32.mrf.mxu1  ;;  %v1883_v61 = vmul.f32 -1.442695, %v560_v28 }
 0x104   :  { %3627 = vst [vmem:[#allocation35_spill] sm:$0xff] %v2977_v20  ;;  %v2979_v40 = vadd.f32 %v2062_v32, %v84_v8 }
 0x105   :  { %v312_v38 = vpop.f32.mrf.mxu1  ;;  %2358 = vpow2.f32 %v1883_v61 }
 0x106   :  { %3628 = vst [vmem:[#allocation36_spill] sm:$0xff] %v2979_v40  ;;  %v2981_v51 = vadd.f32 %v312_v38, %v84_v8  ;;  %v293_v38 = vadd.f32 %v292_v5, %v84_v8  ;;  %v3636_v5 = vld [vmem:[#allocation16_spill] sm:$0xff] }
 0x107   :  { %v2065_v3 = vpop.f32.mrf.mxu1 }
 0x108   :  { %3629 = vst [vmem:[#allocation37_spill] sm:$0xff] %v2981_v51  ;;  %v2983_v34 = vadd.f32 %v2065_v3, %v84_v8 }
 0x109   :  { %v322_v7 = vpop.f32.mrf.mxu1 }
 0x10a   :  { %3630 = vst [vmem:[#allocation38_spill] sm:$0xff] %v2983_v34  ;;  %v2985_v54 = vadd.f32 %v322_v7, %v84_v8  ;;  %v586_v34 = vpop.permute.xlu0 %585  ;;  %v3632_v8 = vmov 0.0  }
 0x10b   :  { %vm587_vm6 = vcmp.eq.s32.totalorder %v586_v34, 1  ;;  %v3638_v34 = vld [vmem:[#allocation19_spill] sm:$0xff] }
 0x10c   :  { %3631 = vst [vmem:[#allocation39_spill] sm:$0xff] %v2985_v54 }
 0x110   :  { %v2357_v45 = vpop.eup %2356 }
 0x111   :  { %v564_v0 = vadd.f32 1.0, %v2357_v45 }
 0x112   :  { %v2359_v26 = vpop.eup %2358 }
 0x113   :  { %2360 = vrcp.f32 %v564_v0  ;;  %v570_v22 = vadd.f32 1.0, %v2359_v26  ;;  %v3640_v26 = vld [vmem:[#allocation14_spill] sm:$0xff] }
 0x114   :  { %vm938_vm7 = vcmp.gt.s32.totalorder %v3640_v26, 2  ;;  %vm1116_vm8 = vcmp.gt.s32.totalorder %v3640_v26, 3  ;;  %vm1472_vm9 = vcmp.gt.s32.totalorder %v3640_v26, 5  ;;  %vm1828_vm10 = vcmp.gt.s32.totalorder %v3640_v26, 7 }
 0x115   :  { %2362 = vrcp.f32 %v570_v22  ;;  %v3641_v22 = vmov 0  }
 0x117   :  { %v555_v53 = vpop.f32.mrf.mxu1 }
 0x118   :  { %v573_v28 = vadd.f32 %v2990_v52, %v555_v53  ;;  %v3639_v53 = vld [vmem:[#allocation12_spill] sm:$0xff] }
 0x119   :  { %v2100_v55 = vpop.f32.mrf.mxu1 }
 0x120   :  { %v2361_v32 = vpop.eup %2360 }
 0x121   :  { %v574_v3 = vmul.f32 %v2361_v32, %v573_v28  ;;  %v939_v28 = vsel %vm938_vm7, 1, %v3641_v22  ;;  %v1117_v32 = vsel %vm1116_vm8, 1, %v3641_v22 }
 0x122   :  { %v2363_v61 = vpop.eup %2362  ;;  %941 = vperm.xlu1 %2355, %v939_v28  }
 0x123   :  { %v575_v7 = vadd.f32 %v574_v3, %v293_v38  ;;  %v577_v45 = vsub.f32 1.0, %v2363_v61  ;;  %v579_v40 = vmul.f32 %v2363_v61, %v2790_v58  ;;  %v1473_v38 = vsel %vm1472_vm9, 1, %v3641_v22 }
 0x124   :  { %v1829_v3 = vsel %vm1828_vm10, 1, %v3641_v22 }
 0x125   :  { %2364 = vtanh.f32 %v575_v7 }
 0x126   :  { %1119 = vperm.xlu1 %2355, %v1117_v32  }
 0x12a   :  { %1475 = vperm.xlu1 %2355, %v1473_v38  }
 0x12e   :  { %1831 = vperm.xlu1 %2355, %v1829_v3  }
 0x132   :  { %v2365_v0 = vpop.eup %2364 }
 0x133   :  { %v578_v54 = vmul.f32 %v2365_v0, %v577_v45  ;;  %v3642_v45 = vld [vmem:[#allocation20_spill] sm:$0xff] }
 0x135   :  { %v580_v51 = vadd.f32 %v579_v40, %v578_v54  ;;  %v3634_v40 = vld [vmem:[#allocation15_spill] sm:$0xff]  ;;  %v3635_v54 = vld [vmem:[#allocation18_spill] sm:$0xff] }
 0x137   :  { %v2995_v55 = vsel %vm587_vm6, %v580_v51, %v2790_v58  ;;  %v3633_v58 = vld [vmem:[#allocation13_spill] sm:$0xff] }
 0x138   :  { %660 = vmatmul.mubr.f32.vlgmr.msra.gmra.mxu0 %v2995_v55  ;;  %2134 = vmatmul.mubr.f32.vlgmr.msra.gmra.mxu1 %v2995_v55  ;;  %v3637_v51 = vld [vmem:[#allocation17_spill] sm:$0xff] }
 0x139   :  { %774 = vmatpush1.msra.mxu0 %v2616_v13  ;;  %2137 = vmatpush3.msra.mxu1 %v2754_v49 }
 0x13a   :  { %775 = vmatprep.subr.mxu0 %v2618_v14  ;;  %2138 = vmatprep.subr.mxu1 %v3632_v8 }
 0x13b   :  { %776 = vmatpush1.msra.mxu0 %v2622_v15  ;;  %2139 = vmatpush3.msra.mxu1 %v2781_v56 }
 0x13c   :  { %777 = vmatprep.subr.mxu0 %v2631_v17  ;;  %2140 = vmatprep.subr.mxu1 %v3632_v8 }
 0x13d   :  { %778 = vmatpush1.msra.mxu0 %v2634_v18  ;;  %2141 = vmatpush3.msra.mxu1 %v2792_v59 }
 0x13e   :  { %779 = vmatprep.subr.mxu0 %v2637_v19  ;;  %2142 = vmatprep.subr.mxu1 %v3632_v8 }
 0x13f   :  { %780 = vmatpush1.msra.mxu0 %v2645_v21  ;;  %2143 = vmatpush3.msra.mxu1 %v2798_v60 }
 0x140   :  { %781 = vmatprep.subr.mxu0 %v2654_v23  ;;  %2144 = vmatprep.subr.mxu1 %v3632_v8 }
 0x141   :  { %782 = vmatpush1.msra.mxu0 %v2657_v24  ;;  %2145 = vmatpush3.msra.mxu1 %v2805_v62 }
 0x142   :  { %783 = vmatprep.subr.mxu0 %v2660_v25  ;;  %2146 = vmatprep.subr.mxu1 %v3632_v8 }
 0x143   :  { %784 = vmatpush1.msra.mxu0 %v2668_v27  ;;  %2147 = vmatpush3.msra.mxu1 %v2811_v63 }
 0x144   :  { %785 = vmatprep.subr.mxu0 %v2677_v29  ;;  %2148 = vmatprep.subr.mxu1 %v3632_v8 }
 0x145   :  { %786 = vmatpush1.msra.mxu0 %v2680_v30  ;;  %2149 = vmatpush3.msra.mxu1 %v2821_v1 }
 0x146   :  { %787 = vmatprep.subr.mxu0 %v2683_v31  ;;  %2150 = vmatprep.subr.mxu1 %v3632_v8 }
 0x147   :  { %788 = vmatpush1.msra.mxu0 %v2691_v33  ;;  %2151 = vmatpush3.msra.mxu1 %v2826_v2 }
 0x148   :  { %789 = vmatprep.subr.mxu0 %v2700_v35  ;;  %2152 = vmatprep.subr.mxu1 %v3632_v8 }
 0x149   :  { %790 = vmatpush1.msra.mxu0 %v2703_v36  ;;  %2153 = vmatpush3.msra.mxu1 %v2836_v4 }
 0x14a   :  { %791 = vmatprep.subr.mxu0 %v2706_v37  ;;  %2154 = vmatprep.subr.mxu1 %v3632_v8 }
 0x14b   :  { %792 = vmatpush1.msra.mxu0 %v2714_v39  ;;  %2155 = vmatpush3.msra.mxu1 %v2841_v6 }
 0x14c   :  { %793 = vmatprep.subr.mxu0 %v2723_v41  ;;  %2156 = vmatprep.subr.mxu1 %v3632_v8 }
 0x14d   :  { %794 = vmatpush1.msra.mxu0 %v2726_v42  ;;  %2157 = vmatpush3.msra.mxu1 %v2849_v9 }
 0x14e   :  { %795 = vmatprep.subr.mxu0 %v2729_v43  ;;  %2158 = vmatprep.subr.mxu1 %v3632_v8 }
 0x14f   :  { %796 = vmatpush1.msra.mxu0 %v2734_v44  ;;  %2159 = vmatpush3.msra.mxu1 %v2854_v10 }
 0x150   :  { %797 = vmatprep.subr.mxu0 %v2743_v46  ;;  %2160 = vmatprep.subr.mxu1 %v3632_v8 }
 0x151   :  { %798 = vmatpush1.msra.mxu0 %v2746_v47  ;;  %2161 = vmatpush3.msra.mxu1 %v2860_v11 }
 0x152   :  { %799 = vmatprep.subr.mxu0 %v2750_v48  ;;  %2162 = vmatprep.subr.mxu1 %v3632_v8 }
 0x153   :  { %800 = vmatpush1.msra.mxu0 %v2759_v50  ;;  %2163 = vmatpush3.msra.mxu1 %v2866_v16 }
 0x154   :  { %801 = vmatprep.subr.mxu0 %v3633_v58  ;;  %2164 = vmatprep.subr.mxu1 %v3632_v8 }
 0x155   :  { %802 = vmatpush1.msra.mxu0 %v3634_v40  ;;  %2165 = vmatpush3.msra.mxu1 %v3635_v54 }
 0x156   :  { %803 = vmatprep.subr.mxu0 %v3636_v5  ;;  %2166 = vmatprep.subr.mxu1 %v3632_v8 }
 0x157   :  { %804 = vmatpush1.msra.mxu0 %v3637_v51  ;;  %837 = vmatprep.mubr.f32.mxu0 %v3632_v8 }
 0x158   :  { %2167 = vmatpush3.msra.mxu1 %v3638_v34  ;;  %2168 = vmatprep.mubr.msk.f32.mxu1 %vm2535_vm5, %v3632_v8 }
 0x159   :  { %951 = vmatprep.subr.mxu0 %v3639_v53  ;;  %2171 = vmatprep.subr.mxu1 %v3632_v8  ;;  %v3643_v53 = vld [vmem:[#allocation21_spill] sm:$0xff] }
 0x1f8   :  { %v661_v7 = vpop.f32.mrf.mxu0  ;;  %v732_v61 = vpop.f32.mrf.mxu1 }
 0x1f9   :  { %v736_v0 = vadd.f32 %v661_v7, %v3642_v45  ;;  %v750_v22 = vadd.f32 %v2990_v52, %v732_v61 }
 0x1fa   :  { %v2135_v12 = vpop.f32.mrf.mxu1  ;;  %v663_v28 = vpop.f32.mrf.mxu0 }
 0x1fb   :  { %v1884_v20 = vmul.f32 -1.442695, %v736_v0  ;;  %v737_v34 = vadd.f32 %v663_v28, %v3643_v53 }
 0x1fd   :  { %2366 = vpow2.f32 %v1884_v20  ;;  %v1885_v51 = vmul.f32 -1.442695, %v737_v34 }
 0x1ff   :  { %2368 = vpow2.f32 %v1885_v51  ;;  %v764_v51 = vpop.permute.xlu0 %763 }
 0x200   :  { %vm765_vm11 = vcmp.eq.s32.totalorder %v764_v51, 1  ;;  %v3193_v51 = vld [vmem:[#allocation6 + $0x108] sm:$0xff] }
 0x20a   :  { %v2367_v32 = vpop.eup %2366 }
 0x20b   :  { %v741_v5 = vadd.f32 1.0, %v2367_v32  ;;  %v942_v32 = vpop.permute.xlu1 %941 }
 0x20c   :  { %v2369_v26 = vpop.eup %2368  ;;  %vm943_vm12 = vcmp.eq.s32.totalorder %v942_v32, 1  ;;  %v3327_v32 = vld [vmem:[#allocation6 + $0xd0] sm:$0xff] }
 0x20d   :  { %2370 = vrcp.f32 %v741_v5  ;;  %v747_v38 = vadd.f32 1.0, %v2369_v26 }
 0x20f   :  { %2372 = vrcp.f32 %v747_v38 }
 0x21a   :  { %v2371_v3 = vpop.eup %2370 }
 0x21b   :  { %v751_v54 = vmul.f32 %v2371_v3, %v750_v22 }
 0x21c   :  { %v2373_v12 = vpop.eup %2372 }
 0x21d   :  { %v752_v7 = vadd.f32 %v751_v54, %v2965_v57  ;;  %v754_v45 = vsub.f32 1.0, %v2373_v12  ;;  %v756_v34 = vmul.f32 %v2373_v12, %v2995_v55  ;;  %v3651_v57 = vld [vmem:[#allocation35_spill] sm:$0xff]  ;;  %v3165_v12 = vld [vmem:[#allocation6 + $0x158] sm:$0xff] }
 0x21f   :  { %2374 = vtanh.f32 %v752_v7  ;;  %v3161_v7 = vld [vmem:[#allocation6 + $0x168] sm:$0xff] }
 0x22c   :  { %v2375_v20 = vpop.eup %2374 }
 0x22d   :  { %v755_v0 = vmul.f32 %v2375_v20, %v754_v45  ;;  %v3169_v45 = vld [vmem:[#allocation6 + $0x150] sm:$0xff]  ;;  %v3173_v20 = vld [vmem:[#allocation6 + $0x140] sm:$0xff] }
 0x22f   :  { %v757_v53 = vadd.f32 %v756_v34, %v755_v0  ;;  %v3177_v0 = vld [vmem:[#allocation6 + $0x138] sm:$0xff]  ;;  %v3185_v34 = vld [vmem:[#allocation6 + $0x120] sm:$0xff] }
 0x231   :  { %v3080_v5 = vsel %vm765_vm11, %v757_v53, %v2995_v55  ;;  %v3201_v53 = vld [vmem:[#allocation6 + $0xf0] sm:$0xff] }
 0x232   :  { %838 = vmatmul.mubr.f32.vlgmr.msra.gmra.mxu0 %v3080_v5  ;;  %2169 = vmatmul.mubr.f32.vlgmr.msra.gmra.mxu1 %v3080_v5 }
 0x233   :  { %952 = vmatpush1.msra.mxu0 %v2616_v13  ;;  %2172 = vmatpush3.msra.mxu1 %v2754_v49  ;;  %v3644_v13 = vld [vmem:[#allocation18_spill] sm:$0xff] }
 0x234   :  { %953 = vmatprep.subr.mxu0 %v2618_v14  ;;  %2173 = vmatprep.subr.mxu1 %v3632_v8  ;;  %v3645_v14 = vld [vmem:[#allocation16_spill] sm:$0xff] }
 0x235   :  { %954 = vmatpush1.msra.mxu0 %v2622_v15  ;;  %2174 = vmatpush3.msra.mxu1 %v2781_v56  ;;  %v3646_v15 = vld [vmem:[#allocation17_spill] sm:$0xff] }
 0x236   :  { %955 = vmatprep.subr.mxu0 %v2631_v17  ;;  %2175 = vmatprep.subr.mxu1 %v3632_v8  ;;  %v3647_v17 = vld [vmem:[#allocation19_spill] sm:$0xff] }
 0x237   :  { %956 = vmatpush1.msra.mxu0 %v2634_v18  ;;  %2176 = vmatpush3.msra.mxu1 %v2792_v59  ;;  %v3648_v18 = vld [vmem:[#allocation12_spill] sm:$0xff] }
 0x238   :  { %957 = vmatprep.subr.mxu0 %v2637_v19  ;;  %2177 = vmatprep.subr.mxu1 %v3632_v8 }
 0x239   :  { %958 = vmatpush1.msra.mxu0 %v2645_v21  ;;  %2178 = vmatpush3.msra.mxu1 %v2798_v60 }
 0x23a   :  { %959 = vmatprep.subr.mxu0 %v2654_v23  ;;  %2179 = vmatprep.subr.mxu1 %v3632_v8  ;;  %v3649_v23 = vld [vmem:[#allocation22_spill] sm:$0xff] }
 0x23b   :  { %960 = vmatpush1.msra.mxu0 %v2657_v24  ;;  %2180 = vmatpush3.msra.mxu1 %v2805_v62 }
 0x23c   :  { %961 = vmatprep.subr.mxu0 %v2660_v25  ;;  %2181 = vmatprep.subr.mxu1 %v3632_v8 }
 0x23d   :  { %962 = vmatpush1.msra.mxu0 %v2668_v27  ;;  %2182 = vmatpush3.msra.mxu1 %v2811_v63 }
 0x23e   :  { %963 = vmatprep.subr.mxu0 %v2677_v29  ;;  %2183 = vmatprep.subr.mxu1 %v3632_v8 }
 0x23f   :  { %964 = vmatpush1.msra.mxu0 %v2680_v30  ;;  %2184 = vmatpush3.msra.mxu1 %v2821_v1  ;;  %v3650_v30 = vld [vmem:[#allocation23_spill] sm:$0xff] }
 0x240   :  { %965 = vmatprep.subr.mxu0 %v2683_v31  ;;  %2185 = vmatprep.subr.mxu1 %v3632_v8 }
 0x241   :  { %966 = vmatpush1.msra.mxu0 %v2691_v33  ;;  %2186 = vmatpush3.msra.mxu1 %v2826_v2 }
 0x242   :  { %967 = vmatprep.subr.mxu0 %v2700_v35  ;;  %2187 = vmatprep.subr.mxu1 %v3632_v8 }
 0x243   :  { %968 = vmatpush1.msra.mxu0 %v2703_v36  ;;  %2188 = vmatpush3.msra.mxu1 %v2836_v4 }
 0x244   :  { %969 = vmatprep.subr.mxu0 %v2706_v37  ;;  %2189 = vmatprep.subr.mxu1 %v3632_v8 }
 0x245   :  { %970 = vmatpush1.msra.mxu0 %v2714_v39  ;;  %2190 = vmatpush3.msra.mxu1 %v2841_v6 }
 0x246   :  { %971 = vmatprep.subr.mxu0 %v2723_v41  ;;  %2191 = vmatprep.subr.mxu1 %v3632_v8 }
 0x247   :  { %972 = vmatpush1.msra.mxu0 %v2726_v42  ;;  %2192 = vmatpush3.msra.mxu1 %v2849_v9 }
 0x248   :  { %973 = vmatprep.subr.mxu0 %v2729_v43  ;;  %2193 = vmatprep.subr.mxu1 %v3632_v8 }
 0x249   :  { %974 = vmatpush1.msra.mxu0 %v2734_v44  ;;  %2194 = vmatpush3.msra.mxu1 %v2854_v10 }
 0x24a   :  { %975 = vmatprep.subr.mxu0 %v2743_v46  ;;  %2195 = vmatprep.subr.mxu1 %v3632_v8 }
 0x24b   :  { %976 = vmatpush1.msra.mxu0 %v2746_v47  ;;  %2196 = vmatpush3.msra.mxu1 %v2860_v11 }
 0x24c   :  { %977 = vmatprep.subr.mxu0 %v2750_v48  ;;  %2197 = vmatprep.subr.mxu1 %v3632_v8 }
 0x24d   :  { %978 = vmatpush1.msra.mxu0 %v2759_v50  ;;  %2198 = vmatpush3.msra.mxu1 %v2866_v16 }
 0x24e   :  { %979 = vmatprep.subr.mxu0 %v3633_v58  ;;  %2199 = vmatprep.subr.mxu1 %v3632_v8 }
 0x24f   :  { %980 = vmatpush1.msra.mxu0 %v3634_v40  ;;  %2200 = vmatpush3.msra.mxu1 %v3644_v13 }
 0x250   :  { %981 = vmatprep.subr.mxu0 %v3645_v14  ;;  %2201 = vmatprep.subr.mxu1 %v3632_v8 }
 0x251   :  { %982 = vmatpush1.msra.mxu0 %v3646_v15  ;;  %1015 = vmatprep.mubr.f32.mxu0 %v3632_v8 }
 0x252   :  { %2202 = vmatpush3.msra.mxu1 %v3647_v17  ;;  %2203 = vmatprep.mubr.msk.f32.mxu1 %vm2535_vm5, %v3632_v8 }
 0x253   :  { %1129 = vmatprep.subr.mxu0 %v3648_v18  ;;  %2206 = vmatprep.subr.mxu1 %v3632_v8  ;;  %v3217_v18 = vld [vmem:[#allocation6 + $0xc0] sm:$0xff] }
 0x2f2   :  { %v839_v19 = vpop.f32.mrf.mxu0  ;;  %v910_v21 = vpop.f32.mrf.mxu1 }
 0x2f3   :  { %v914_v24 = vadd.f32 %v839_v19, %v3649_v23  ;;  %v928_v41 = vadd.f32 %v2990_v52, %v910_v21  ;;  %v3225_v19 = vld [vmem:[#allocation6 + $0xa8] sm:$0xff]  ;;  %v3233_v21 = vld [vmem:[#allocation6 + $0x90] sm:$0xff]  ;;  %v3241_v23 = vld [vmem:[#allocation6 + $0x78] sm:$0xff] }
 0x2f4   :  { %v2170_v25 = vpop.f32.mrf.mxu1  ;;  %v841_v29 = vpop.f32.mrf.mxu0 }
 0x2f5   :  { %v1886_v27 = vmul.f32 -1.442695, %v914_v24  ;;  %v915_v31 = vadd.f32 %v841_v29, %v3650_v30 }
 0x2f7   :  { %2376 = vpow2.f32 %v1886_v27  ;;  %v1887_v33 = vmul.f32 -1.442695, %v915_v31  ;;  %v3655_v27 = vld [vmem:[#allocation34_spill] sm:$0xff] }
 0x2f9   :  { %2378 = vpow2.f32 %v1887_v33 }
 0x304   :  { %v2377_v35 = vpop.eup %2376 }
 0x305   :  { %v919_v36 = vadd.f32 1.0, %v2377_v35 }
 0x306   :  { %v2379_v37 = vpop.eup %2378 }
 0x307   :  { %2380 = vrcp.f32 %v919_v36  ;;  %v925_v39 = vadd.f32 1.0, %v2379_v37  ;;  %v1120_v37 = vpop.permute.xlu1 %1119 }
 0x308   :  { %vm1121_vm13 = vcmp.eq.s32.totalorder %v1120_v37, 1 }
 0x309   :  { %2382 = vrcp.f32 %v925_v39 }
 0x314   :  { %v2381_v42 = vpop.eup %2380 }
 0x315   :  { %v929_v43 = vmul.f32 %v2381_v42, %v928_v41  ;;  %v3285_v42 = vld [vmem:[#allocation6 + $0x178] sm:$0xff] }
 0x316   :  { %v2383_v54 = vpop.eup %2382 }
 0x317   :  { %v930_v55 = vadd.f32 %v929_v43, %v3651_v57  ;;  %v932_v61 = vsub.f32 1.0, %v2383_v54  ;;  %v934_v38 = vmul.f32 %v2383_v54, %v3080_v5  ;;  %v3291_v43 = vld [vmem:[#allocation6 + $0x160] sm:$0xff]  ;;  %v3297_v57 = vld [vmem:[#allocation6 + $0x148] sm:$0xff]  ;;  %v3309_v54 = vld [vmem:[#allocation6 + $0x118] sm:$0xff] }
 0x319   :  { %2384 = vtanh.f32 %v930_v55  ;;  %v3303_v55 = vld [vmem:[#allocation6 + $0x130] sm:$0xff] }
 0x326   :  { %v2385_v28 = vpop.eup %2384 }
 0x327   :  { %v933_v26 = vmul.f32 %v2385_v28, %v932_v61  ;;  %v3315_v61 = vld [vmem:[#allocation6 + $0x100] sm:$0xff]  ;;  %v3321_v28 = vld [vmem:[#allocation6 + $0xe8] sm:$0xff] }
 0x329   :  { %v935_v22 = vadd.f32 %v934_v38, %v933_v26  ;;  %v3333_v26 = vld [vmem:[#allocation6 + $0xb8] sm:$0xff]  ;;  %v3339_v38 = vld [vmem:[#allocation6 + $0xa0] sm:$0xff] }
 0x32b   :  { %v3157_v3 = vsel %vm943_vm12, %v935_v22, %v3080_v5  ;;  %v3209_v5 = vld [vmem:[#allocation6 + $0xd8] sm:$0xff]  ;;  %v3345_v22 = vld [vmem:[#allocation6 + $0x88] sm:$0xff] }
 0x32c   :  { %1016 = vmatmul.mubr.f32.vlgmr.msra.gmra.mxu0 %v3157_v3  ;;  %2204 = vmatmul.mubr.f32.vlgmr.msra.gmra.mxu1 %v3157_v3 }
 0x32d   :  { %1130 = vmatpush1.msra.mxu0 %v3161_v7  ;;  %2207 = vmatpush3.msra.mxu1 %v2754_v49  ;;  %v3181_v49 = vld [vmem:[#allocation6 + $0x128] sm:$0xff] }
 0x32e   :  { %1131 = vmatprep.subr.mxu0 %v3165_v12  ;;  %2208 = vmatprep.subr.mxu1 %v3632_v8 }
 0x32f   :  { %1132 = vmatpush1.msra.mxu0 %v3169_v45  ;;  %2209 = vmatpush3.msra.mxu1 %v2781_v56  ;;  %v3189_v56 = vld [vmem:[#allocation6 + $0x110] sm:$0xff] }
 0x330   :  { %1133 = vmatprep.subr.mxu0 %v3173_v20  ;;  %2210 = vmatprep.subr.mxu1 %v3632_v8 }
 0x331   :  { %1134 = vmatpush1.msra.mxu0 %v3177_v0  ;;  %2211 = vmatpush3.msra.mxu1 %v2792_v59  ;;  %v3197_v59 = vld [vmem:[#allocation6 + $0xf8] sm:$0xff] }
 0x332   :  { %1135 = vmatprep.subr.mxu0 %v3181_v49  ;;  %2212 = vmatprep.subr.mxu1 %v3632_v8 }
 0x333   :  { %1136 = vmatpush1.msra.mxu0 %v3185_v34  ;;  %2213 = vmatpush3.msra.mxu1 %v2798_v60  ;;  %v3205_v60 = vld [vmem:[#allocation6 + $0xe0] sm:$0xff] }
 0x334   :  { %1137 = vmatprep.subr.mxu0 %v3189_v56  ;;  %2214 = vmatprep.subr.mxu1 %v3632_v8 }
 0x335   :  { %1138 = vmatpush1.msra.mxu0 %v3193_v51  ;;  %2215 = vmatpush3.msra.mxu1 %v2805_v62  ;;  %v3213_v62 = vld [vmem:[#allocation6 + $0xc8] sm:$0xff] }
 0x336   :  { %1139 = vmatprep.subr.mxu0 %v3197_v59  ;;  %2216 = vmatprep.subr.mxu1 %v3632_v8 }
 0x337   :  { %1140 = vmatpush1.msra.mxu0 %v3201_v53  ;;  %2217 = vmatpush3.msra.mxu1 %v2811_v63  ;;  %v3221_v63 = vld [vmem:[#allocation6 + $0xb0] sm:$0xff] }
 0x338   :  { %1141 = vmatprep.subr.mxu0 %v3205_v60  ;;  %2218 = vmatprep.subr.mxu1 %v3632_v8 }
 0x339   :  { %1142 = vmatpush1.msra.mxu0 %v3209_v5  ;;  %2219 = vmatpush3.msra.mxu1 %v2821_v1  ;;  %v3229_v1 = vld [vmem:[#allocation6 + $0x98] sm:$0xff] }
 0x33a   :  { %1143 = vmatprep.subr.mxu0 %v3213_v62  ;;  %2220 = vmatprep.subr.mxu1 %v3632_v8 }
 0x33b   :  { %1144 = vmatpush1.msra.mxu0 %v3217_v18  ;;  %2221 = vmatpush3.msra.mxu1 %v2826_v2  ;;  %v3237_v2 = vld [vmem:[#allocation6 + $0x80] sm:$0xff] }
 0x33c   :  { %1145 = vmatprep.subr.mxu0 %v3221_v63  ;;  %2222 = vmatprep.subr.mxu1 %v3632_v8 }
 0x33d   :  { %1146 = vmatpush1.msra.mxu0 %v3225_v19  ;;  %2223 = vmatpush3.msra.mxu1 %v2836_v4  ;;  %v3245_v4 = vld [vmem:[#allocation6 + $0x68] sm:$0xff] }
 0x33e   :  { %1147 = vmatprep.subr.mxu0 %v3229_v1  ;;  %2224 = vmatprep.subr.mxu1 %v3632_v8 }
 0x33f   :  { %1148 = vmatpush1.msra.mxu0 %v3233_v21  ;;  %2225 = vmatpush3.msra.mxu1 %v2841_v6 }
 0x340   :  { %1149 = vmatprep.subr.mxu0 %v3237_v2  ;;  %2226 = vmatprep.subr.mxu1 %v3632_v8 }
 0x341   :  { %1150 = vmatpush1.msra.mxu0 %v3241_v23  ;;  %2227 = vmatpush3.msra.mxu1 %v2849_v9 }
 0x342   :  { %1151 = vmatprep.subr.mxu0 %v3245_v4  ;;  %2228 = vmatprep.subr.mxu1 %v3632_v8 }
 0x343   :  { %1152 = vmatpush1.msra.mxu0 %v2734_v44  ;;  %2229 = vmatpush3.msra.mxu1 %v2854_v10  ;;  %v3270_v44 = vld [vmem:[#allocation6 + $0x170] sm:$0xff] }
 0x344   :  { %1153 = vmatprep.subr.mxu0 %v2743_v46  ;;  %2230 = vmatprep.subr.mxu1 %v3632_v8  ;;  %3652 = vst [vmem:[#allocation13_spill] sm:$0xff] %v3270_v44 }
 0x345   :  { %1154 = vmatpush1.msra.mxu0 %v2746_v47  ;;  %2231 = vmatpush3.msra.mxu1 %v2860_v11  ;;  %v3654_v11 = vld [vmem:[#allocation25_spill] sm:$0xff] }
 0x346   :  { %1155 = vmatprep.subr.mxu0 %v2750_v48  ;;  %2232 = vmatprep.subr.mxu1 %v3632_v8  ;;  %v3653_v48 = vld [vmem:[#allocation24_spill] sm:$0xff] }
 0x347   :  { %1156 = vmatpush1.msra.mxu0 %v2759_v50  ;;  %2233 = vmatpush3.msra.mxu1 %v2866_v16 }
 0x348   :  { %1157 = vmatprep.subr.mxu0 %v3633_v58  ;;  %2234 = vmatprep.subr.mxu1 %v3632_v8 }
 0x349   :  { %1158 = vmatpush1.msra.mxu0 %v3634_v40  ;;  %2235 = vmatpush3.msra.mxu1 %v3644_v13 }
 0x34a   :  { %1159 = vmatprep.subr.mxu0 %v3645_v14  ;;  %2236 = vmatprep.subr.mxu1 %v3632_v8 }
 0x34b   :  { %1160 = vmatpush1.msra.mxu0 %v3646_v15  ;;  %1193 = vmatprep.mubr.f32.mxu0 %v3632_v8 }
 0x34c   :  { %2237 = vmatpush3.msra.mxu1 %v3647_v17  ;;  %2238 = vmatprep.mubr.msk.f32.mxu1 %vm2535_vm5, %v3632_v8 }
 0x34d   :  { %1307 = vmatprep.subr.mxu0 %v3270_v44  ;;  %2241 = vmatprep.subr.mxu1 %v3632_v8 }
 0x3ec   :  { %v1017_v46 = vpop.f32.mrf.mxu0  ;;  %v1088_v47 = vpop.f32.mrf.mxu1 }
 0x3ed   :  { %v1092_v50 = vadd.f32 %v1017_v46, %v3653_v48  ;;  %v1106_v17 = vadd.f32 %v2990_v52, %v1088_v47  ;;  %v3353_v46 = vld [vmem:[#allocation6 + $0x70] sm:$0xff]  ;;  %v3360_v48 = vld [vmem:[#allocation6 + $0x48] sm:$0xff] }
 0x3ee   :  { %v2205_v6 = vpop.f32.mrf.mxu1  ;;  %v1019_v10 = vpop.f32.mrf.mxu0  ;;  %v3356_v47 = vld [vmem:[#allocation6 + $0x50] sm:$0xff] }
 0x3ef   :  { %v1888_v9 = vmul.f32 -1.442695, %v1092_v50  ;;  %v1093_v16 = vadd.f32 %v1019_v10, %v3654_v11  ;;  %v3363_v50 = vld [vmem:[#allocation6 + $0x58] sm:$0xff]  ;;  %v3373_v10 = vld [vmem:[#allocation6 + $0x40] sm:$0xff] }
 0x3f0   :  { %v3366_v6 = vld [vmem:[#allocation6 + $0x38] sm:$0xff]  ;;  %v3376_v11 = vld [vmem:[#allocation6 + $0x20] sm:$0xff] }
 0x3f1   :  { %2386 = vpow2.f32 %v1888_v9  ;;  %v1889_v58 = vmul.f32 -1.442695, %v1093_v16  ;;  %v3370_v9 = vld [vmem:[#allocation6 + $0x30] sm:$0xff]  ;;  %v3380_v16 = vld [vmem:[#allocation6 + $0x18] sm:$0xff] }
 0x3f3   :  { %2388 = vpow2.f32 %v1889_v58  ;;  %v3383_v58 = vld [vmem:[#allocation6 + $0x28] sm:$0xff] }
 0x3f4   :  { %3656 = vst [vmem:[#allocation15_spill] sm:$0xff] %v3383_v58 }
 0x3fe   :  { %v2387_v40 = vpop.eup %2386 }
 0x3ff   :  { %v1097_v13 = vadd.f32 1.0, %v2387_v40  ;;  %v3386_v40 = vld [vmem:[#allocation6 + $0x8] sm:$0xff] }
 0x400   :  { %v2389_v14 = vpop.eup %2388  ;;  %3657 = vst [vmem:[#allocation14_spill] sm:$0xff] %v3386_v40 }
 0x401   :  { %2390 = vrcp.f32 %v1097_v13  ;;  %v1103_v15 = vadd.f32 1.0, %v2389_v14  ;;  %v3390_v13 = vld [vmem:[#allocation6] sm:$0xff]  ;;  %v3394_v14 = vld [vmem:[#allocation6 + $0x10] sm:$0xff] }
 0x402   :  { %3658 = vst [vmem:[#allocation20_spill] sm:$0xff] %v3390_v13  ;;  %3659 = vst [vmem:[#allocation21_spill] sm:$0xff] %v3394_v14 }
 0x403   :  { %2392 = vrcp.f32 %v1103_v15 }
 0x40e   :  { %v2391_v24 = vpop.eup %2390 }
 0x40f   :  { %v1107_v25 = vmul.f32 %v2391_v24, %v1106_v17  ;;  %v3660_v24 = vld [vmem:[#allocation26_spill] sm:$0xff] }
 0x410   :  { %v2393_v30 = vpop.eup %2392 }
 0x411   :  { %v1108_v29 = vadd.f32 %v1107_v25, %v3655_v27  ;;  %v1110_v31 = vsub.f32 1.0, %v2393_v30  ;;  %v1112_v36 = vmul.f32 %v2393_v30, %v3157_v3 }
 0x413   :  { %2394 = vtanh.f32 %v1108_v29 }
 0x420   :  { %v2395_v33 = vpop.eup %2394 }
 0x421   :  { %v1111_v35 = vmul.f32 %v2395_v33, %v1110_v31  ;;  %v3661_v31 = vld [vmem:[#allocation27_spill] sm:$0xff] }
 0x423   :  { %v1113_v39 = vadd.f32 %v1112_v36, %v1111_v35 }
 0x425   :  { %v3280_v41 = vsel %vm1121_vm13, %v1113_v39, %v3157_v3  ;;  %v3350_v3 = vld [vmem:[#allocation6 + $0x60] sm:$0xff] }
 0x426   :  { %1194 = vmatmul.mubr.f32.vlgmr.msra.gmra.mxu0 %v3280_v41  ;;  %2239 = vmatmul.mubr.f32.vlgmr.msra.gmra.mxu1 %v3280_v41 }
 0x427   :  { %1308 = vmatpush1.msra.mxu0 %v3161_v7  ;;  %2242 = vmatpush3.msra.mxu1 %v3285_v42 }
 0x428   :  { %1309 = vmatprep.subr.mxu0 %v3165_v12  ;;  %2243 = vmatprep.subr.mxu1 %v3632_v8 }
 0x429   :  { %1310 = vmatpush1.msra.mxu0 %v3169_v45  ;;  %2244 = vmatpush3.msra.mxu1 %v3291_v43 }
 0x42a   :  { %1311 = vmatprep.subr.mxu0 %v3173_v20  ;;  %2245 = vmatprep.subr.mxu1 %v3632_v8 }
 0x42b   :  { %1312 = vmatpush1.msra.mxu0 %v3177_v0  ;;  %2246 = vmatpush3.msra.mxu1 %v3297_v57 }
 0x42c   :  { %1313 = vmatprep.subr.mxu0 %v3181_v49  ;;  %2247 = vmatprep.subr.mxu1 %v3632_v8 }
 0x42d   :  { %1314 = vmatpush1.msra.mxu0 %v3185_v34  ;;  %2248 = vmatpush3.msra.mxu1 %v3303_v55 }
 0x42e   :  { %1315 = vmatprep.subr.mxu0 %v3189_v56  ;;  %2249 = vmatprep.subr.mxu1 %v3632_v8 }
 0x42f   :  { %1316 = vmatpush1.msra.mxu0 %v3193_v51  ;;  %2250 = vmatpush3.msra.mxu1 %v3309_v54 }
 0x430   :  { %1317 = vmatprep.subr.mxu0 %v3197_v59  ;;  %2251 = vmatprep.subr.mxu1 %v3632_v8 }
 0x431   :  { %1318 = vmatpush1.msra.mxu0 %v3201_v53  ;;  %2252 = vmatpush3.msra.mxu1 %v3315_v61 }
 0x432   :  { %1319 = vmatprep.subr.mxu0 %v3205_v60  ;;  %2253 = vmatprep.subr.mxu1 %v3632_v8 }
 0x433   :  { %1320 = vmatpush1.msra.mxu0 %v3209_v5  ;;  %2254 = vmatpush3.msra.mxu1 %v3321_v28 }
 0x434   :  { %1321 = vmatprep.subr.mxu0 %v3213_v62  ;;  %2255 = vmatprep.subr.mxu1 %v3632_v8 }
 0x435   :  { %1322 = vmatpush1.msra.mxu0 %v3217_v18  ;;  %2256 = vmatpush3.msra.mxu1 %v3327_v32 }
 0x436   :  { %1323 = vmatprep.subr.mxu0 %v3221_v63  ;;  %2257 = vmatprep.subr.mxu1 %v3632_v8 }
 0x437   :  { %1324 = vmatpush1.msra.mxu0 %v3225_v19  ;;  %2258 = vmatpush3.msra.mxu1 %v3333_v26 }
 0x438   :  { %1325 = vmatprep.subr.mxu0 %v3229_v1  ;;  %2259 = vmatprep.subr.mxu1 %v3632_v8 }
 0x439   :  { %1326 = vmatpush1.msra.mxu0 %v3233_v21  ;;  %2260 = vmatpush3.msra.mxu1 %v3339_v38 }
 0x43a   :  { %1327 = vmatprep.subr.mxu0 %v3237_v2  ;;  %2261 = vmatprep.subr.mxu1 %v3632_v8 }
 0x43b   :  { %1328 = vmatpush1.msra.mxu0 %v3241_v23  ;;  %2262 = vmatpush3.msra.mxu1 %v3345_v22 }
 0x43c   :  { %1329 = vmatprep.subr.mxu0 %v3245_v4  ;;  %2263 = vmatprep.subr.mxu1 %v3632_v8 }
 0x43d   :  { %1330 = vmatpush1.msra.mxu0 %v3350_v3  ;;  %2264 = vmatpush3.msra.mxu1 %v3353_v46 }
 0x43e   :  { %1331 = vmatprep.subr.mxu0 %v3356_v47  ;;  %2265 = vmatprep.subr.mxu1 %v3632_v8 }
 0x43f   :  { %1332 = vmatpush1.msra.mxu0 %v3360_v48  ;;  %2266 = vmatpush3.msra.mxu1 %v3363_v50 }
 0x440   :  { %1333 = vmatprep.subr.mxu0 %v3366_v6  ;;  %2267 = vmatprep.subr.mxu1 %v3632_v8 }
 0x441   :  { %1334 = vmatpush1.msra.mxu0 %v3370_v9  ;;  %2268 = vmatpush3.msra.mxu1 %v3373_v10 }
 0x442   :  { %1335 = vmatprep.subr.mxu0 %v3376_v11  ;;  %2269 = vmatprep.subr.mxu1 %v3632_v8 }
 0x443   :  { %1336 = vmatpush1.msra.mxu0 %v3380_v16  ;;  %2270 = vmatpush3.msra.mxu1 %v3383_v58  ;;  %v3662_v58 = vld [vmem:[#allocation37_spill] sm:$0xff] }
 0x444   :  { %1337 = vmatprep.subr.mxu0 %v3386_v40  ;;  %2271 = vmatprep.subr.mxu1 %v3632_v8 }
 0x445   :  { %1338 = vmatpush1.msra.mxu0 %v3390_v13  ;;  %1371 = vmatprep.mubr.f32.mxu0 %v3632_v8 }
 0x446   :  { %2272 = vmatpush3.msra.mxu1 %v3394_v14  ;;  %2273 = vmatprep.mubr.msk.f32.mxu1 %vm2535_vm5, %v3632_v8 }
 0x447   :  { %1485 = vmatprep.subr.mxu0 %v3270_v44  ;;  %2276 = vmatprep.subr.mxu1 %v3632_v8 }
 0x4e6   :  { %v1195_v15 = vpop.f32.mrf.mxu0  ;;  %v1266_v17 = vpop.f32.mrf.mxu1 }
 0x4e7   :  { %v1270_v25 = vadd.f32 %v1195_v15, %v3660_v24  ;;  %v1284_v44 = vadd.f32 %v2990_v52, %v1266_v17 }
 0x4e8   :  { %v2240_v27 = vpop.f32.mrf.mxu1  ;;  %v1197_v30 = vpop.f32.mrf.mxu0 }
 0x4e9   :  { %v1890_v29 = vmul.f32 -1.442695, %v1270_v25  ;;  %v1271_v33 = vadd.f32 %v1197_v30, %v3661_v31  ;;  %v1298_v31 = vpop.permute.xlu0 %1297 }
 0x4ea   :  { %vm1299_vm14 = vcmp.eq.s32.totalorder %v1298_v31, 1 }
 0x4eb   :  { %2396 = vpow2.f32 %v1890_v29  ;;  %v1891_v35 = vmul.f32 -1.442695, %v1271_v33 }
 0x4ed   :  { %2398 = vpow2.f32 %v1891_v35 }
 0x4f8   :  { %v2397_v36 = vpop.eup %2396 }
 0x4f9   :  { %v1275_v37 = vadd.f32 1.0, %v2397_v36  ;;  %v3668_v36 = vld [vmem:[#allocation28_spill] sm:$0xff] }
 0x4fa   :  { %v2399_v39 = vpop.eup %2398 }
 0x4fb   :  { %2400 = vrcp.f32 %v1275_v37  ;;  %v1281_v14 = vadd.f32 1.0, %v2399_v39 }
 0x4fd   :  { %2402 = vrcp.f32 %v1281_v14 }
 0x508   :  { %v2401_v13 = vpop.eup %2400 }
 0x509   :  { %v1285_v40 = vmul.f32 %v2401_v13, %v1284_v44  ;;  %v3663_v44 = vld [vmem:[#allocation15_spill] sm:$0xff]  ;;  %v3667_v13 = vld [vmem:[#allocation13_spill] sm:$0xff] }
 0x50a   :  { %v2403_v24 = vpop.eup %2402 }
 0x50b   :  { %v1286_v15 = vadd.f32 %v1285_v40, %v3662_v58  ;;  %v1288_v25 = vsub.f32 1.0, %v2403_v24  ;;  %v1290_v30 = vmul.f32 %v2403_v24, %v3280_v41  ;;  %v3665_v58 = vld [vmem:[#allocation20_spill] sm:$0xff]  ;;  %v3666_v40 = vld [vmem:[#allocation21_spill] sm:$0xff] }
 0x50d   :  { %2404 = vtanh.f32 %v1286_v15 }
 0x51a   :  { %v2405_v27 = vpop.eup %2404 }
 0x51b   :  { %v1289_v29 = vmul.f32 %v2405_v27, %v1288_v25  ;;  %v3669_v25 = vld [vmem:[#allocation29_spill] sm:$0xff] }
 0x51d   :  { %v1291_v33 = vadd.f32 %v1290_v30, %v1289_v29 }
 0x51f   :  { %v3407_v35 = vsel %vm1299_vm14, %v1291_v33, %v3280_v41  ;;  %v3664_v41 = vld [vmem:[#allocation14_spill] sm:$0xff] }
 0x520   :  { %1372 = vmatmul.mubr.f32.vlgmr.msra.gmra.mxu0 %v3407_v35  ;;  %2274 = vmatmul.mubr.f32.vlgmr.msra.gmra.mxu1 %v3407_v35 }
 0x521   :  { %1486 = vmatpush1.msra.mxu0 %v3161_v7  ;;  %2277 = vmatpush3.msra.mxu1 %v3285_v42 }
 0x522   :  { %1487 = vmatprep.subr.mxu0 %v3165_v12  ;;  %2278 = vmatprep.subr.mxu1 %v3632_v8 }
 0x523   :  { %1488 = vmatpush1.msra.mxu0 %v3169_v45  ;;  %2279 = vmatpush3.msra.mxu1 %v3291_v43 }
 0x524   :  { %1489 = vmatprep.subr.mxu0 %v3173_v20  ;;  %2280 = vmatprep.subr.mxu1 %v3632_v8 }
 0x525   :  { %1490 = vmatpush1.msra.mxu0 %v3177_v0  ;;  %2281 = vmatpush3.msra.mxu1 %v3297_v57 }
 0x526   :  { %1491 = vmatprep.subr.mxu0 %v3181_v49  ;;  %2282 = vmatprep.subr.mxu1 %v3632_v8 }
 0x527   :  { %1492 = vmatpush1.msra.mxu0 %v3185_v34  ;;  %2283 = vmatpush3.msra.mxu1 %v3303_v55 }
 0x528   :  { %1493 = vmatprep.subr.mxu0 %v3189_v56  ;;  %2284 = vmatprep.subr.mxu1 %v3632_v8 }
 0x529   :  { %1494 = vmatpush1.msra.mxu0 %v3193_v51  ;;  %2285 = vmatpush3.msra.mxu1 %v3309_v54 }
 0x52a   :  { %1495 = vmatprep.subr.mxu0 %v3197_v59  ;;  %2286 = vmatprep.subr.mxu1 %v3632_v8 }
 0x52b   :  { %1496 = vmatpush1.msra.mxu0 %v3201_v53  ;;  %2287 = vmatpush3.msra.mxu1 %v3315_v61 }
 0x52c   :  { %1497 = vmatprep.subr.mxu0 %v3205_v60  ;;  %2288 = vmatprep.subr.mxu1 %v3632_v8 }
 0x52d   :  { %1498 = vmatpush1.msra.mxu0 %v3209_v5  ;;  %2289 = vmatpush3.msra.mxu1 %v3321_v28 }
 0x52e   :  { %1499 = vmatprep.subr.mxu0 %v3213_v62  ;;  %2290 = vmatprep.subr.mxu1 %v3632_v8 }
 0x52f   :  { %1500 = vmatpush1.msra.mxu0 %v3217_v18  ;;  %2291 = vmatpush3.msra.mxu1 %v3327_v32 }
 0x530   :  { %1501 = vmatprep.subr.mxu0 %v3221_v63  ;;  %2292 = vmatprep.subr.mxu1 %v3632_v8 }
 0x531   :  { %1502 = vmatpush1.msra.mxu0 %v3225_v19  ;;  %2293 = vmatpush3.msra.mxu1 %v3333_v26 }
 0x532   :  { %1503 = vmatprep.subr.mxu0 %v3229_v1  ;;  %2294 = vmatprep.subr.mxu1 %v3632_v8 }
 0x533   :  { %1504 = vmatpush1.msra.mxu0 %v3233_v21  ;;  %2295 = vmatpush3.msra.mxu1 %v3339_v38 }
 0x534   :  { %1505 = vmatprep.subr.mxu0 %v3237_v2  ;;  %2296 = vmatprep.subr.mxu1 %v3632_v8 }
 0x535   :  { %1506 = vmatpush1.msra.mxu0 %v3241_v23  ;;  %2297 = vmatpush3.msra.mxu1 %v3345_v22 }
 0x536   :  { %1507 = vmatprep.subr.mxu0 %v3245_v4  ;;  %2298 = vmatprep.subr.mxu1 %v3632_v8 }
 0x537   :  { %1508 = vmatpush1.msra.mxu0 %v3350_v3  ;;  %2299 = vmatpush3.msra.mxu1 %v3353_v46 }
 0x538   :  { %1509 = vmatprep.subr.mxu0 %v3356_v47  ;;  %2300 = vmatprep.subr.mxu1 %v3632_v8 }
 0x539   :  { %1510 = vmatpush1.msra.mxu0 %v3360_v48  ;;  %2301 = vmatpush3.msra.mxu1 %v3363_v50 }
 0x53a   :  { %1511 = vmatprep.subr.mxu0 %v3366_v6  ;;  %2302 = vmatprep.subr.mxu1 %v3632_v8 }
 0x53b   :  { %1512 = vmatpush1.msra.mxu0 %v3370_v9  ;;  %2303 = vmatpush3.msra.mxu1 %v3373_v10 }
 0x53c   :  { %1513 = vmatprep.subr.mxu0 %v3376_v11  ;;  %2304 = vmatprep.subr.mxu1 %v3632_v8 }
 0x53d   :  { %1514 = vmatpush1.msra.mxu0 %v3380_v16  ;;  %2305 = vmatpush3.msra.mxu1 %v3663_v44  ;;  %v3670_v44 = vld [vmem:[#allocation36_spill] sm:$0xff] }
 0x53e   :  { %1515 = vmatprep.subr.mxu0 %v3664_v41  ;;  %2306 = vmatprep.subr.mxu1 %v3632_v8 }
 0x53f   :  { %1516 = vmatpush1.msra.mxu0 %v3665_v58  ;;  %1549 = vmatprep.mubr.f32.mxu0 %v3632_v8 }
 0x540   :  { %2307 = vmatpush3.msra.mxu1 %v3666_v40  ;;  %2308 = vmatprep.mubr.msk.f32.mxu1 %vm2535_vm5, %v3632_v8 }
 0x541   :  { %1663 = vmatprep.subr.mxu0 %v3667_v13  ;;  %2311 = vmatprep.subr.mxu1 %v3632_v8 }
 0x5e0   :  { %v1373_v14 = vpop.f32.mrf.mxu0  ;;  %v1444_v17 = vpop.f32.mrf.mxu1 }
 0x5e1   :  { %v1448_v37 = vadd.f32 %v1373_v14, %v3668_v36  ;;  %v1462_v13 = vadd.f32 %v2990_v52, %v1444_v17  ;;  %v3671_v52 = vld [vmem:[#allocation15_spill] sm:$0xff] }
 0x5e2   :  { %v2275_v39 = vpop.f32.mrf.mxu1  ;;  %v1375_v24 = vpop.f32.mrf.mxu0 }
 0x5e3   :  { %v1892_v15 = vmul.f32 -1.442695, %v1448_v37  ;;  %v1449_v27 = vadd.f32 %v1375_v24, %v3669_v25  ;;  %v1476_v25 = vpop.permute.xlu1 %1475 }
 0x5e4   :  { %vm1477_vm15 = vcmp.eq.s32.totalorder %v1476_v25, 1 }
 0x5e5   :  { %2406 = vpow2.f32 %v1892_v15  ;;  %v1893_v29 = vmul.f32 -1.442695, %v1449_v27 }
 0x5e7   :  { %2408 = vpow2.f32 %v1893_v29 }
 0x5f2   :  { %v2407_v30 = vpop.eup %2406 }
 0x5f3   :  { %v1453_v31 = vadd.f32 1.0, %v2407_v30 }
 0x5f4   :  { %v2409_v33 = vpop.eup %2408 }
 0x5f5   :  { %2410 = vrcp.f32 %v1453_v31  ;;  %v1459_v40 = vadd.f32 1.0, %v2409_v33 }
 0x5f7   :  { %2412 = vrcp.f32 %v1459_v40  ;;  %v3680_v40 = vld [vmem:[#allocation38_spill] sm:$0xff] }
 0x602   :  { %v2411_v58 = vpop.eup %2410 }
 0x603   :  { %v1463_v41 = vmul.f32 %v2411_v58, %v1462_v13  ;;  %v1832_v13 = vpop.permute.xlu1 %1831 }
 0x604   :  { %v2413_v36 = vpop.eup %2412  ;;  %vm1833_vm1 = vcmp.eq.s32.totalorder %v1832_v13, 1 }
 0x605   :  { %v1464_v14 = vadd.f32 %v1463_v41, %v3670_v44  ;;  %v1466_v37 = vsub.f32 1.0, %v2413_v36  ;;  %v1468_v24 = vmul.f32 %v2413_v36, %v3407_v35 }
 0x607   :  { %2414 = vtanh.f32 %v1464_v14 }
 0x614   :  { %v2415_v39 = vpop.eup %2414 }
 0x615   :  { %v1467_v15 = vmul.f32 %v2415_v39, %v1466_v37 }
 0x617   :  { %v1469_v27 = vadd.f32 %v1468_v24, %v1467_v15 }
 0x619   :  { %v3484_v29 = vsel %vm1477_vm15, %v1469_v27, %v3407_v35 }
 0x61a   :  { %1550 = vmatmul.mubr.f32.vlgmr.msra.gmra.mxu0 %v3484_v29  ;;  %2309 = vmatmul.mubr.f32.vlgmr.msra.gmra.mxu1 %v3484_v29 }
 0x61b   :  { %1664 = vmatpush1.msra.mxu0 %v3161_v7  ;;  %2312 = vmatpush3.msra.mxu1 %v3285_v42  ;;  %v3672_v7 = vld [vmem:[#allocation14_spill] sm:$0xff] }
 0x61c   :  { %1665 = vmatprep.subr.mxu0 %v3165_v12  ;;  %2313 = vmatprep.subr.mxu1 %v3632_v8  ;;  %v3673_v12 = vld [vmem:[#allocation20_spill] sm:$0xff] }
 0x61d   :  { %1666 = vmatpush1.msra.mxu0 %v3169_v45  ;;  %2314 = vmatpush3.msra.mxu1 %v3291_v43  ;;  %v3674_v45 = vld [vmem:[#allocation21_spill] sm:$0xff] }
 0x61e   :  { %1667 = vmatprep.subr.mxu0 %v3173_v20  ;;  %2315 = vmatprep.subr.mxu1 %v3632_v8 }
 0x61f   :  { %1668 = vmatpush1.msra.mxu0 %v3177_v0  ;;  %2316 = vmatpush3.msra.mxu1 %v3297_v57 }
 0x620   :  { %1669 = vmatprep.subr.mxu0 %v3181_v49  ;;  %2317 = vmatprep.subr.mxu1 %v3632_v8  ;;  %v3675_v49 = vld [vmem:[#allocation30_spill] sm:$0xff] }
 0x621   :  { %1670 = vmatpush1.msra.mxu0 %v3185_v34  ;;  %2318 = vmatpush3.msra.mxu1 %v3303_v55  ;;  %v1654_v55 = vpop.permute.xlu0 %1653 }
 0x622   :  { %1671 = vmatprep.subr.mxu0 %v3189_v56  ;;  %2319 = vmatprep.subr.mxu1 %v3632_v8  ;;  %vm1655_vm0 = vcmp.eq.s32.totalorder %v1654_v55, 1 }
 0x623   :  { %1672 = vmatpush1.msra.mxu0 %v3193_v51  ;;  %2320 = vmatpush3.msra.mxu1 %v3309_v54 }
 0x624   :  { %1673 = vmatprep.subr.mxu0 %v3197_v59  ;;  %2321 = vmatprep.subr.mxu1 %v3632_v8 }
 0x625   :  { %1674 = vmatpush1.msra.mxu0 %v3201_v53  ;;  %2322 = vmatpush3.msra.mxu1 %v3315_v61  ;;  %v3676_v53 = vld [vmem:[#allocation31_spill] sm:$0xff] }
 0x626   :  { %1675 = vmatprep.subr.mxu0 %v3205_v60  ;;  %2323 = vmatprep.subr.mxu1 %v3632_v8 }
 0x627   :  { %1676 = vmatpush1.msra.mxu0 %v3209_v5  ;;  %2324 = vmatpush3.msra.mxu1 %v3321_v28 }
 0x628   :  { %1677 = vmatprep.subr.mxu0 %v3213_v62  ;;  %2325 = vmatprep.subr.mxu1 %v3632_v8 }
 0x629   :  { %1678 = vmatpush1.msra.mxu0 %v3217_v18  ;;  %2326 = vmatpush3.msra.mxu1 %v3327_v32 }
 0x62a   :  { %1679 = vmatprep.subr.mxu0 %v3221_v63  ;;  %2327 = vmatprep.subr.mxu1 %v3632_v8 }
 0x62b   :  { %1680 = vmatpush1.msra.mxu0 %v3225_v19  ;;  %2328 = vmatpush3.msra.mxu1 %v3333_v26 }
 0x62c   :  { %1681 = vmatprep.subr.mxu0 %v3229_v1  ;;  %2329 = vmatprep.subr.mxu1 %v3632_v8 }
 0x62d   :  { %1682 = vmatpush1.msra.mxu0 %v3233_v21  ;;  %2330 = vmatpush3.msra.mxu1 %v3339_v38 }
 0x62e   :  { %1683 = vmatprep.subr.mxu0 %v3237_v2  ;;  %2331 = vmatprep.subr.mxu1 %v3632_v8 }
 0x62f   :  { %1684 = vmatpush1.msra.mxu0 %v3241_v23  ;;  %2332 = vmatpush3.msra.mxu1 %v3345_v22  ;;  %v3677_v23 = vld [vmem:[#allocation39_spill] sm:$0xff]  ;;  %v3678_v22 = vld [vmem:[#allocation32_spill] sm:$0xff] }
 0x630   :  { %1685 = vmatprep.subr.mxu0 %v3245_v4  ;;  %2333 = vmatprep.subr.mxu1 %v3632_v8 }
 0x631   :  { %1686 = vmatpush1.msra.mxu0 %v3350_v3  ;;  %2334 = vmatpush3.msra.mxu1 %v3353_v46 }
 0x632   :  { %1687 = vmatprep.subr.mxu0 %v3356_v47  ;;  %2335 = vmatprep.subr.mxu1 %v3632_v8 }
 0x633   :  { %1688 = vmatpush1.msra.mxu0 %v3360_v48  ;;  %2336 = vmatpush3.msra.mxu1 %v3363_v50  ;;  %v3679_v50 = vld [vmem:[#allocation33_spill] sm:$0xff] }
 0x634   :  { %1689 = vmatprep.subr.mxu0 %v3366_v6  ;;  %2337 = vmatprep.subr.mxu1 %v3632_v8 }
 0x635   :  { %1690 = vmatpush1.msra.mxu0 %v3370_v9  ;;  %2338 = vmatpush3.msra.mxu1 %v3373_v10 }
 0x636   :  { %1691 = vmatprep.subr.mxu0 %v3376_v11  ;;  %2339 = vmatprep.subr.mxu1 %v3632_v8 }
 0x637   :  { %1692 = vmatpush1.msra.mxu0 %v3380_v16  ;;  %2340 = vmatpush3.msra.mxu1 %v3671_v52 }
 0x638   :  { %1693 = vmatprep.subr.mxu0 %v3672_v7  ;;  %2341 = vmatprep.subr.mxu1 %v3632_v8 }
 0x639   :  { %1694 = vmatpush1.msra.mxu0 %v3673_v12  ;;  %1727 = vmatprep.mubr.f32.mxu0 %v3632_v8 }
 0x63a   :  { %2342 = vmatpush3.msra.mxu1 %v3674_v45  ;;  %2343 = vmatprep.mubr.msk.f32.mxu1 %vm2535_vm5, %v3632_v8  ;;  %v2484_v8 = vld [vmem:[%s3573_s6] ss:$0 sm:$0xff] }
 0x6da   :  { %v1551_v20 = vpop.f32.mrf.mxu0  ;;  %v1622_v0 = vpop.f32.mrf.mxu1 }
 0x6db   :  { %v1626_v34 = vadd.f32 %v1551_v20, %v3675_v49  ;;  %v1640_v1 = vadd.f32 %v2484_v8, %v1622_v0 }
 0x6dc   :  { %v2310_v56 = vpop.f32.mrf.mxu1  ;;  %v1553_v59 = vpop.f32.mrf.mxu0 }
 0x6dd   :  { %v1894_v51 = vmul.f32 -1.442695, %v1626_v34  ;;  %v1627_v60 = vadd.f32 %v1553_v59, %v3676_v53 }
 0x6df   :  { %2416 = vpow2.f32 %v1894_v51  ;;  %v1895_v5 = vmul.f32 -1.442695, %v1627_v60 }
 0x6e1   :  { %2418 = vpow2.f32 %v1895_v5 }
 0x6ec   :  { %v2417_v62 = vpop.eup %2416 }
 0x6ed   :  { %v1631_v18 = vadd.f32 1.0, %v2417_v62 }
 0x6ee   :  { %v2419_v63 = vpop.eup %2418 }
 0x6ef   :  { %2420 = vrcp.f32 %v1631_v18  ;;  %v1637_v19 = vadd.f32 1.0, %v2419_v63 }
 0x6f1   :  { %2422 = vrcp.f32 %v1637_v19 }
 0x6fc   :  { %v2421_v21 = vpop.eup %2420 }
 0x6fd   :  { %v1641_v2 = vmul.f32 %v2421_v21, %v1640_v1 }
 0x6fe   :  { %v2423_v42 = vpop.eup %2422 }
 0x6ff   :  { %v1642_v4 = vadd.f32 %v1641_v2, %v3677_v23  ;;  %v1644_v43 = vsub.f32 1.0, %v2423_v42  ;;  %v1646_v61 = vmul.f32 %v2423_v42, %v3484_v29 }
 0x701   :  { %2424 = vtanh.f32 %v1642_v4 }
 0x70e   :  { %v2425_v57 = vpop.eup %2424 }
 0x70f   :  { %v1645_v54 = vmul.f32 %v2425_v57, %v1644_v43 }
 0x711   :  { %v1647_v28 = vadd.f32 %v1646_v61, %v1645_v54 }
 0x713   :  { %v1656_v32 = vsel %vm1655_vm0, %v1647_v28, %v3484_v29 }
 0x714   :  { %1728 = vmatmul.mubr.f32.vlgmr.msra.gmra.mxu0 %v1656_v32  ;;  %2344 = vmatmul.mubr.f32.vlgmr.msra.gmra.mxu1 %v1656_v32 }
 0x7d4   :  { %v1729_v26 = vpop.f32.mrf.mxu0  ;;  %v1800_v38 = vpop.f32.mrf.mxu1 }
 0x7d5   :  { %v1804_v3 = vadd.f32 %v1729_v26, %v3678_v22  ;;  %v1818_v44 = vadd.f32 %v2484_v8, %v1800_v38 }
 0x7d6   :  { %v2345_v46 = vpop.f32.mrf.mxu1  ;;  %v1731_v48 = vpop.f32.mrf.mxu0 }
 0x7d7   :  { %v1896_v47 = vmul.f32 -1.442695, %v1804_v3  ;;  %v1805_v6 = vadd.f32 %v1731_v48, %v3679_v50 }
 0x7d9   :  { %2426 = vpow2.f32 %v1896_v47  ;;  %v1897_v9 = vmul.f32 -1.442695, %v1805_v6 }
 0x7db   :  { %2428 = vpow2.f32 %v1897_v9 }
 0x7e6   :  { %v2427_v10 = vpop.eup %2426 }
 0x7e7   :  { %v1809_v11 = vadd.f32 1.0, %v2427_v10 }
 0x7e8   :  { %v2429_v16 = vpop.eup %2428 }
 0x7e9   :  { %2430 = vrcp.f32 %v1809_v11  ;;  %v1815_v35 = vadd.f32 1.0, %v2429_v16 }
 0x7eb   :  { %2432 = vrcp.f32 %v1815_v35 }
 0x7f6   :  { %v2431_v41 = vpop.eup %2430 }
 0x7f7   :  { %v1819_v58 = vmul.f32 %v2431_v41, %v1818_v44 }
 0x7f8   :  { %v2433_v30 = vpop.eup %2432 }
 0x7f9   :  { %v1820_v17 = vadd.f32 %v1819_v58, %v3680_v40  ;;  %v1822_v31 = vsub.f32 1.0, %v2433_v30  ;;  %v1824_v36 = vmul.f32 %v2433_v30, %v1656_v32 }
 0x7fb   :  { %2434 = vtanh.f32 %v1820_v17 }
 0x808   :  { %v2435_v33 = vpop.eup %2434 }
 0x809   :  { %v1823_v14 = vmul.f32 %v2435_v33, %v1822_v31 }
 0x80b   :  { %v1825_v37 = vadd.f32 %v1824_v36, %v1823_v14 }
 0x80d   :  { %v1834_v39 = vsel %vm1833_vm1, %v1825_v37, %v1656_v32 }
 0x80e   :  { %1835 = vst [vmem:[#allocation3] sm:$0xff] %v1834_v39 }
 0x80f PF:  { %s2536_s6 = smov [#allocation9]  }
 0x810   :  { %s1847_s27 = sshll.u32 %s2536_s6, 4  ;;  %s1848_s27 = int_to_ptr.vmem [resolvable:$true] %s1847_s27 }
 0x811   :  { %s2505_s28 = scalar_lea.vmem %s1848_s27, 128  ;;  %p2510_p7 = scmp.lt.s32.totalorder %s1848_s27, %s1848_s27 }
 0x812   :  { %p2506_p6 = scmp.ne.s32.totalorder %s1848_s27, %s2505_s28  ;;  %p2511_p8 = scmp.lt.s32.totalorder %s2505_s28, %s2505_s28 }
 0x814   :  { %p2512_p9 = por %p2511_p8, %p2510_p7 }
 0x815   :  { %v1839_v15 = vld [vmem:[#allocation3] sm:$0xff] }
 0x816   :  { %1840 = vst [vmem:[#allocation9] sm:$0xff] %v1839_v15  ;;  %p2513_p10 = pnand %p2512_p9, %p2506_p6 }
 0x818   :  { %2516 = shalt.err (!%p2513_p10)
}
 0x819   :  { %1850 = dma.vmem_to_hbm [thread:$0]  %s1848_s27, 128, %s3574_s7, [#allocation8]  }
 0x81a   :  { %2527 = dma.done.wait [#allocation8], 128  }
 0x81b   :  { %2528 = vsyncadd [#allocation8], 4294967168 }
 0x81c   :  { %1854 = vsyncpa [#allocation7], 1 }
 0x81d   :  { %1855 = vsyncpa [#allocation8], 1 }

</bundles_post_ra>
